<compile_context>
chip_gen: v7x
topology: tpu7x:2x2x1
jax: 0.10.0
libtpu: 0.0.40
codegen_flags: <defaults>
</compile_context>

<pallas_src>
import jax
import jax.numpy as jnp
import numpy as np
from jax.experimental import pallas as pl
from jax.experimental.pallas import tpu as pltpu

HIDDEN_DIM = 10
EPS_OCCL = 0.005
BN_EPS = 1e-5
_INV_PI = float(1.0 / np.pi)

# head indices in the stacked / fused parameter layout
PHI_L, PHI_R, D_L_V, D_R_V, D_L_O, D_R_O = 0, 1, 2, 3, 4, 5
V_L, V_R = 0, 1


def _round_up(n, m):
    return ((n + m - 1) // m) * m


def _arctan_kernel(x):
    """float32-accurate arctan (Cephes atanf) from supported VPU ops only."""
    ax = jnp.abs(x)
    big = ax > 2.414213562373095      # tan(3*pi/8)
    mid = ax > 0.41421356237309503    # tan(pi/8)
    # note: -1/ax is inf at ax==0 but that branch is never selected there
    xr = jnp.where(big, -1.0 / ax, jnp.where(mid, (ax - 1.0) / (ax + 1.0), ax))
    y0 = jnp.where(big, jnp.float32(jnp.pi / 2),
                   jnp.where(mid, jnp.float32(jnp.pi / 4), jnp.float32(0.0)))
    z = xr * xr
    p = (((8.05374449538e-2 * z - 1.38776856032e-1) * z + 1.99777106478e-1) * z
         - 3.33329491539e-1)
    r = y0 + xr * z * p + xr
    return jnp.where(x < 0.0, -r, r)


def _pipeline_kernel(xy_ref,                       # [8, N]  (x, y, 0...) feature-major
                     w1a_ref, w1g_ref,             # [64, 8] fused layer-1 (xy / g pass)
                     g1_ref, be1_ref,              # [64, 1] BN1 gamma/beta
                     w2_ref, g2_ref, be2_ref,      # [64, 64], [64,1], [64,1]
                     w3_ref, b3_ref,               # [8, 64], [8, 1]
                     vw1_ref, vg1_ref, vbe1_ref,   # [24, 8], [24,1], [24,1]
                     vw2_ref, vb2_ref,             # [8, 24], [8, 1]
                     out_ref):                     # [16, N] packed output slab
    f32 = jnp.float32
    n = xy_ref.shape[1]
    n_inv = 1.0 / n

    xy = xy_ref[...]                                # [8, N]
    x = xy[0:1, :]                                  # [1, N]

    g1, be1 = g1_ref[...], be1_ref[...]
    g2, be2 = g2_ref[...], be2_ref[...]
    w2 = w2_ref[...]
    w3, b3 = w3_ref[...], b3_ref[...]

    def bn(h, gamma, beta):
        # training-mode BatchNorm1d folded to one per-row scale+shift.
        # (The Linear bias that would precede it is dropped host-side: a
        # per-feature constant cancels exactly under mean subtraction.)
        mu = jnp.sum(h, axis=1, keepdims=True) * n_inv
        msq = jnp.sum(h * h, axis=1, keepdims=True) * n_inv
        var = msq - mu * mu                          # biased batch variance
        s = gamma * jax.lax.rsqrt(var + BN_EPS)      # [rows, 1]
        t = beta - mu * s                            # [rows, 1]
        return h * s + t

    relu = lambda v: jnp.maximum(v, 0.0)
    sig = jax.nn.sigmoid

    def trunk_tail(h1):
        # h1: [64, N] pre-BN layer-1 activations of all six heads (padded rows 0)
        h = relu(bn(h1, g1, be1))
        h = jnp.dot(w2, h, preferred_element_type=f32)      # MXU, bias dropped
        h = relu(bn(h, g2, be2))
        return jnp.dot(w3, h, preferred_element_type=f32) + b3   # [8, N]

    def Hfn(phi):
        # H(phi) = 0.5*(1 + 2*arctan(phi/0.1)/pi) = 0.5 + arctan(10*phi)/pi
        return 0.5 + _arctan_kernel(phi * 10.0) * _INV_PI

    # ---- pass 1: all six trunk heads evaluated on xy (one wide MXU pass) ----
    heads_xy = trunk_tail(jnp.dot(w1a_ref[...], xy, preferred_element_type=f32))
    Hlr = Hfn(heads_xy[0:2, :])                     # [Hl; Hr]        (batched)
    s_xy = sig(heads_xy[2:6, :])                    # [dlv; drv; dlo; dro]
    d = s_xy[0:2, :] * Hlr + s_xy[2:4, :] * (1.0 - Hlr)   # [dl; dr]
    dl = d[0:1, :]
    dr = d[1:2, :]
    g_x = jnp.concatenate([x - dl, x + dr], axis=0)        # [gl_x; gr_x]

    # ---- pass 2: the six needed head-on-g evaluations in one wide pass ----
    # g_stack rows: gl_x, gr_x, y, 0, 0, 0, 0, 0.  w1g col0 -> gl_x (heads
    # PHI_R/D_R_V/D_R_O), col1 -> gr_x (heads PHI_L/D_L_V/D_L_O), col2 -> y.
    g_stack = jnp.concatenate([g_x, xy[1:7, :]], axis=0)   # [8, N]
    heads_g = trunk_tail(jnp.dot(w1g_ref[...], g_stack, preferred_element_type=f32))
    Hg = Hfn(heads_g[0:2, :])                       # [H(phi_l(gr)); H(phi_r(gl))]
    s_g = sig(heads_g[2:6, :])                      # [dlv(gr); drv(gl); dlo(gr); dro(gl)]
    dg = s_g[0:2, :] * Hg + s_g[2:4, :] * (1.0 - Hg)       # [dg_r; dg_l]

    u = jnp.concatenate([dl - dg[1:2, :], dr - dg[0:1, :]], axis=0)   # [ul; ur]
    e = -jnp.log(EPS_OCCL + (1.0 - EPS_OCCL) * jnp.exp(-jnp.abs(u)))  # [e_l; e_r]

    # ---- both v-nets fused (one wide MXU pass) ----
    hv = relu(bn(jnp.dot(vw1_ref[...], xy, preferred_element_type=f32),
                 vg1_ref[...], vbe1_ref[...]))               # [24, N]
    v = sig(jnp.dot(vw2_ref[...], hv, preferred_element_type=f32) + vb2_ref[...])

    # ---- single lane-dense packed output slab [16, N], one unmasked store ----
    # rows: e_l, e_r, gl_x, gr_x, phi_l, phi_r, dl, dr, vl, vr, 0...
    pad = jnp.zeros((out_ref.shape[0] - 10, n), f32)
    out_ref[...] = jnp.concatenate(
        [e, g_x, heads_xy[0:2, :], d, v[0:2, :], pad], axis=0)


# --------------------------- host-side fusion ---------------------------

def fuse_params(params, H=HIDDEN_DIM):
    """Build fused / block-diagonal, feature-major, sublane-padded weights.

    Drops b1/b2/vb1 entirely (they feed training-mode BatchNorm and cancel
    exactly).  Padded gamma/beta rows are zero so padded trunk rows stay 0.
    """
    (w1, b1, g1, be1, w2, b2, g2, be2, w3, b3,
     vw1, vb1, vg1, vbe1, vw2, vb2) = params
    del b1, b2, vb1                      # exact no-ops before BatchNorm
    f32 = jnp.float32

    T = 6 * H                            # 60  trunk width
    TP = _round_up(T, 8)                 # 64
    V = 2 * H                            # 20  fused v-net width
    VP = _round_up(V, 8)                 # 24
    KP = 8                               # padded input-feature dim (x, y, 0...)
    HP = 8                               # padded head-output rows

    w1t = jnp.transpose(w1, (0, 2, 1))                     # [6, H, 2]

    W1a = jnp.zeros((TP, KP), f32).at[:T, :2].set(w1t.reshape(T, 2))

    W1g = jnp.zeros((TP, KP), f32)
    for k in range(6):
        xcol = 0 if k in (PHI_R, D_R_V, D_R_O) else 1       # gl_x vs gr_x
        W1g = W1g.at[k * H:(k + 1) * H, xcol].set(w1t[k][:, 0])
        W1g = W1g.at[k * H:(k + 1) * H, 2].set(w1t[k][:, 1])   # shared y column

    def padcol(a, rows):
        return jnp.zeros((rows, 1), f32).at[:a.size, 0].set(a.reshape(-1))

    g1c, be1c = padcol(g1, TP), padcol(be1, TP)
    g2c, be2c = padcol(g2, TP), padcol(be2, TP)

    W2 = jnp.zeros((TP, TP), f32)
    for k in range(6):
        W2 = W2.at[k * H:(k + 1) * H, k * H:(k + 1) * H].set(w2[k].T)

    W3 = jnp.zeros((HP, TP), f32)
    for k in range(6):
        W3 = W3.at[k, k * H:(k + 1) * H].set(w3[k][:, 0])
    b3c = padcol(b3, HP)

    Wv1 = jnp.zeros((VP, KP), f32).at[:V, :2].set(
        jnp.transpose(vw1, (0, 2, 1)).reshape(V, 2))
    vg1c, vbe1c = padcol(vg1, VP), padcol(vbe1, VP)
    Wv2 = jnp.zeros((HP, VP), f32)
    for k in range(2):
        Wv2 = Wv2.at[k, k * H:(k + 1) * H].set(vw2[k][:, 0])
    vb2c = padcol(vb2, HP)

    return (W1a, W1g, g1c, be1c, W2, g2c, be2c, W3, b3c,
            Wv1, vg1c, vbe1c, Wv2, vb2c)


def pipeline_forward(xy, params, hidden_dim=HIDDEN_DIM):
    """Runs the whole Pipeline forward in a single Pallas invocation."""
    N = xy.shape[0]
    f32 = jnp.float32
    fused = fuse_params(params, hidden_dim)
    xy_fm = jnp.zeros((8, N), f32).at[0:2, :].set(xy.T)     # [8, N] padded slab

    vmem = lambda: pl.BlockSpec(memory_space=pltpu.MemorySpace.VMEM)
    out = pl.pallas_call(
        _pipeline_kernel,
        out_shape=jax.ShapeDtypeStruct((16, N), f32),
        in_specs=[vmem() for _ in range(1 + len(fused))],
        out_specs=vmem(),
        compiler_params=pltpu.CompilerParams(
            vmem_limit_bytes=32 * 1024 * 1024),
    )(xy_fm, *fused)

    # unpack the lane-dense slab back to the module's 10 outputs (free plumbing)
    y = xy[:, 1:2]
    e_l = out[0:1, :].T
    e_r = out[1:2, :].T
    gl = jnp.concatenate([out[2:3, :].T, y], axis=1)
    gr = jnp.concatenate([out[3:4, :].T, y], axis=1)
    phil = out[4:5, :].T
    phir = out[5:6, :].T
    dl = out[6:7, :].T
    dr = out[7:8, :].T
    vl = out[8:9, :].T
    vr = out[9:10, :].T
    return (e_l, gl, phil, dl, vl, e_r, gr, phir, dr, vr)


# --------------------------- params & reference ---------------------------

def init_params(key, hidden_dim=HIDDEN_DIM):
    """Deterministic synthetic parameters (torch-default-style Linear init;
    BN gamma=1, beta=0). 3-layer MLPs stacked [6,...]; v-nets stacked [2,...]."""
    H = hidden_dim
    ks = jax.random.split(key, 10)

    def unif(k, shape, fan_in):
        bound = 1.0 / float(np.sqrt(fan_in))
        return jax.random.uniform(k, shape, jnp.float32, -bound, bound)

    w1 = unif(ks[0], (6, 2, H), 2)
    b1 = unif(ks[1], (6, 1, H), 2)
    g1 = jnp.ones((6, 1, H), jnp.float32)
    be1 = jnp.zeros((6, 1, H), jnp.float32)
    w2 = unif(ks[2], (6, H, H), H)
    b2 = unif(ks[3], (6, 1, H), H)
    g2 = jnp.ones((6, 1, H), jnp.float32)
    be2 = jnp.zeros((6, 1, H), jnp.float32)
    w3 = unif(ks[4], (6, H, 1), H)
    b3 = unif(ks[5], (6, 1, 1), H)
    vw1 = unif(ks[6], (2, 2, H), 2)
    vb1 = unif(ks[7], (2, 1, H), 2)
    vg1 = jnp.ones((2, 1, H), jnp.float32)
    vbe1 = jnp.zeros((2, 1, H), jnp.float32)
    vw2 = unif(ks[8], (2, H, 1), H)
    vb2 = unif(ks[9], (2, 1, 1), H)
    return (w1, b1, g1, be1, w2, b2, g2, be2, w3, b3,
            vw1, vb1, vg1, vbe1, vw2, vb2)


def pipeline_reference(xy, params):
    """Pure-JAX mirror of Pipeline.calculate_aux (torch semantics, per-head)."""
    (w1, b1, g1, be1, w2, b2, g2, be2, w3, b3,
     vw1, vb1, vg1, vbe1, vw2, vb2) = params

    def bn(x, gamma, beta):
        mu = jnp.mean(x, axis=0, keepdims=True)
        var = jnp.mean((x - mu) ** 2, axis=0, keepdims=True)
        return (x - mu) / jnp.sqrt(var + BN_EPS) * gamma + beta

    def mlp3(x, k):
        h = jax.nn.relu(bn(x @ w1[k] + b1[k], g1[k], be1[k]))
        h = jax.nn.relu(bn(h @ w2[k] + b2[k], g2[k], be2[k]))
        return h @ w3[k] + b3[k]

    def disp(x, k):
        return jax.nn.sigmoid(mlp3(x, k))

    def vnet(x, k):
        h = jax.nn.relu(bn(x @ vw1[k] + vb1[k], vg1[k], vbe1[k]))
        return jax.nn.sigmoid(h @ vw2[k] + vb2[k])

    def Hfn(phi):
        return 0.5 * (1.0 + 2.0 * jnp.arctan(phi / 0.1) / jnp.pi)

    def calculate(phi1, dv1, do1, phi2, dv2, do2, sign):
        phi_xy = mlp3(xy, phi1)
        Hphi = Hfn(phi_xy)
        d = disp(xy, dv1) * Hphi + disp(xy, do1) * (1.0 - Hphi)
        g = jnp.concatenate([xy[:, 0:1] + sign * d, xy[:, 1:2]], axis=1)
        Hg = Hfn(mlp3(g, phi2))
        dg = disp(g, dv2) * Hg + disp(g, do2) * (1.0 - Hg)
        u = d - dg
        e_occ = -jnp.log(EPS_OCCL + (1.0 - EPS_OCCL) * jnp.exp(-jnp.abs(u)))
        return e_occ, g, phi_xy, d

    e_l, gl, phil, dl = calculate(PHI_L, D_L_V, D_L_O, PHI_R, D_R_V, D_R_O, -1.0)
    e_r, gr, phir, dr = calculate(PHI_R, D_R_V, D_R_O, PHI_L, D_L_V, D_L_O, +1.0)
    return (e_l, gl, phil, dl, vnet(xy, V_L),
            e_r, gr, phir, dr, vnet(xy, V_R))


if __name__ == "__main__":
    key = jax.random.PRNGKey(0)
    kx, kp = jax.random.split(key)
    N = 128                                   # small, lane-aligned batch
    xy = jax.random.uniform(kx, (N, 2), jnp.float32, -1.0, 1.0)   # batch['xy']
    params = init_params(kp, HIDDEN_DIM)

    outs = jax.block_until_ready(pipeline_forward(xy, params))

    refs = pipeline_reference(xy, params)
    for o, r in zip(outs, refs):
        np.testing.assert_allclose(np.asarray(o), np.asarray(r),
                                   atol=1e-4, rtol=1e-4)
    print("KERNEL_OK")
</pallas_src>

<mosaic_0001>
module attributes {stable_mosaic.version = 11 : i64} {
  func.func @_pipeline_kernel(%arg0: memref<8x128xf32, #tpu.memory_space<vmem>>, %arg1: memref<64x8xf32, #tpu.memory_space<vmem>>, %arg2: memref<64x8xf32, #tpu.memory_space<vmem>>, %arg3: memref<64x1xf32, #tpu.memory_space<vmem>>, %arg4: memref<64x1xf32, #tpu.memory_space<vmem>>, %arg5: memref<64x64xf32, #tpu.memory_space<vmem>>, %arg6: memref<64x1xf32, #tpu.memory_space<vmem>>, %arg7: memref<64x1xf32, #tpu.memory_space<vmem>>, %arg8: memref<8x64xf32, #tpu.memory_space<vmem>>, %arg9: memref<8x1xf32, #tpu.memory_space<vmem>>, %arg10: memref<24x8xf32, #tpu.memory_space<vmem>>, %arg11: memref<24x1xf32, #tpu.memory_space<vmem>>, %arg12: memref<24x1xf32, #tpu.memory_space<vmem>>, %arg13: memref<8x24xf32, #tpu.memory_space<vmem>>, %arg14: memref<8x1xf32, #tpu.memory_space<vmem>>, %arg15: memref<16x128xf32, #tpu.memory_space<vmem>>) attributes {dimension_semantics = [], scalar_prefetch = 0 : i64, scratch_operands = 0 : i64, tpu.core_type = #tpu.core_type<tc>} {
    %c0 = arith.constant 0 : index
    %c0_0 = arith.constant 0 : index
    %0 = vector.load %arg0[%c0, %c0_0] : memref<8x128xf32, #tpu.memory_space<vmem>>, vector<8x128xf32>
    %1 = vector.extract_strided_slice %0 {offsets = [0, 0], sizes = [1, 128], strides = [1, 1]} : vector<8x128xf32> to vector<1x128xf32>
    %c0_1 = arith.constant 0 : index
    %c0_2 = arith.constant 0 : index
    %2 = vector.load %arg3[%c0_1, %c0_2] : memref<64x1xf32, #tpu.memory_space<vmem>>, vector<64x1xf32>
    %c0_3 = arith.constant 0 : index
    %c0_4 = arith.constant 0 : index
    %3 = vector.load %arg4[%c0_3, %c0_4] : memref<64x1xf32, #tpu.memory_space<vmem>>, vector<64x1xf32>
    %c0_5 = arith.constant 0 : index
    %c0_6 = arith.constant 0 : index
    %4 = vector.load %arg6[%c0_5, %c0_6] : memref<64x1xf32, #tpu.memory_space<vmem>>, vector<64x1xf32>
    %c0_7 = arith.constant 0 : index
    %c0_8 = arith.constant 0 : index
    %5 = vector.load %arg7[%c0_7, %c0_8] : memref<64x1xf32, #tpu.memory_space<vmem>>, vector<64x1xf32>
    %c0_9 = arith.constant 0 : index
    %c0_10 = arith.constant 0 : index
    %6 = vector.load %arg5[%c0_9, %c0_10] : memref<64x64xf32, #tpu.memory_space<vmem>>, vector<64x64xf32>
    %c0_11 = arith.constant 0 : index
    %c0_12 = arith.constant 0 : index
    %7 = vector.load %arg8[%c0_11, %c0_12] : memref<8x64xf32, #tpu.memory_space<vmem>>, vector<8x64xf32>
    %c0_13 = arith.constant 0 : index
    %c0_14 = arith.constant 0 : index
    %8 = vector.load %arg9[%c0_13, %c0_14] : memref<8x1xf32, #tpu.memory_space<vmem>>, vector<8x1xf32>
    %c0_15 = arith.constant 0 : index
    %c0_16 = arith.constant 0 : index
    %9 = vector.load %arg1[%c0_15, %c0_16] : memref<64x8xf32, #tpu.memory_space<vmem>>, vector<64x8xf32>
    %cst = arith.constant dense<0.000000e+00> : vector<64x128xf32>
    %10 = tpu.matmul %9, %0, %cst {dimension_numbers = #tpu.dot_dimension_numbers<[1], [0], [0], [1], [0, 0, 1, 1], [], []>} : vector<64x8xf32>, vector<8x128xf32>, vector<64x128xf32> -> vector<64x128xf32>
    %cst_17 = arith.constant dense<0.000000e+00> : vector<64xf32>
    %11 = vector.multi_reduction <add>, %10, %cst_17 [1] : vector<64x128xf32> to vector<64xf32>
    %12 = vector.shape_cast %11 : vector<64xf32> to vector<64x1xf32>
    %cst_18 = arith.constant 7.812500e-03 : f32
    %13 = vector.broadcast %cst_18 : f32 to vector<64x1xf32>
    %14 = arith.mulf %12, %13 : vector<64x1xf32>
    %15 = arith.mulf %10, %10 : vector<64x128xf32>
    %cst_19 = arith.constant dense<0.000000e+00> : vector<64xf32>
    %16 = vector.multi_reduction <add>, %15, %cst_19 [1] : vector<64x128xf32> to vector<64xf32>
    %17 = vector.shape_cast %16 : vector<64xf32> to vector<64x1xf32>
    %cst_20 = arith.constant 7.812500e-03 : f32
    %18 = vector.broadcast %cst_20 : f32 to vector<64x1xf32>
    %19 = arith.mulf %17, %18 : vector<64x1xf32>
    %20 = arith.mulf %14, %14 : vector<64x1xf32>
    %21 = arith.subf %19, %20 : vector<64x1xf32>
    %cst_21 = arith.constant 9.99999974E-6 : f32
    %22 = vector.broadcast %cst_21 : f32 to vector<64x1xf32>
    %23 = arith.addf %21, %22 : vector<64x1xf32>
    %24 = math.rsqrt %23 : vector<64x1xf32>
    %25 = arith.mulf %2, %24 : vector<64x1xf32>
    %26 = arith.mulf %14, %25 : vector<64x1xf32>
    %27 = arith.subf %3, %26 : vector<64x1xf32>
    %28 = vector.broadcast %25 : vector<64x1xf32> to vector<64x128xf32>
    %29 = arith.mulf %10, %28 : vector<64x128xf32>
    %30 = vector.broadcast %27 : vector<64x1xf32> to vector<64x128xf32>
    %31 = arith.addf %29, %30 : vector<64x128xf32>
    %cst_22 = arith.constant 0.000000e+00 : f32
    %32 = vector.broadcast %cst_22 : f32 to vector<64x128xf32>
    %33 = arith.maximumf %31, %32 : vector<64x128xf32>
    %cst_23 = arith.constant dense<0.000000e+00> : vector<64x128xf32>
    %34 = tpu.matmul %6, %33, %cst_23 {dimension_numbers = #tpu.dot_dimension_numbers<[1], [0], [0], [1], [0, 0, 1, 1], [], []>} : vector<64x64xf32>, vector<64x128xf32>, vector<64x128xf32> -> vector<64x128xf32>
    %cst_24 = arith.constant dense<0.000000e+00> : vector<64xf32>
    %35 = vector.multi_reduction <add>, %34, %cst_24 [1] : vector<64x128xf32> to vector<64xf32>
    %36 = vector.shape_cast %35 : vector<64xf32> to vector<64x1xf32>
    %cst_25 = arith.constant 7.812500e-03 : f32
    %37 = vector.broadcast %cst_25 : f32 to vector<64x1xf32>
    %38 = arith.mulf %36, %37 : vector<64x1xf32>
    %39 = arith.mulf %34, %34 : vector<64x128xf32>
    %cst_26 = arith.constant dense<0.000000e+00> : vector<64xf32>
    %40 = vector.multi_reduction <add>, %39, %cst_26 [1] : vector<64x128xf32> to vector<64xf32>
    %41 = vector.shape_cast %40 : vector<64xf32> to vector<64x1xf32>
    %cst_27 = arith.constant 7.812500e-03 : f32
    %42 = vector.broadcast %cst_27 : f32 to vector<64x1xf32>
    %43 = arith.mulf %41, %42 : vector<64x1xf32>
    %44 = arith.mulf %38, %38 : vector<64x1xf32>
    %45 = arith.subf %43, %44 : vector<64x1xf32>
    %cst_28 = arith.constant 9.99999974E-6 : f32
    %46 = vector.broadcast %cst_28 : f32 to vector<64x1xf32>
    %47 = arith.addf %45, %46 : vector<64x1xf32>
    %48 = math.rsqrt %47 : vector<64x1xf32>
    %49 = arith.mulf %4, %48 : vector<64x1xf32>
    %50 = arith.mulf %38, %49 : vector<64x1xf32>
    %51 = arith.subf %5, %50 : vector<64x1xf32>
    %52 = vector.broadcast %49 : vector<64x1xf32> to vector<64x128xf32>
    %53 = arith.mulf %34, %52 : vector<64x128xf32>
    %54 = vector.broadcast %51 : vector<64x1xf32> to vector<64x128xf32>
    %55 = arith.addf %53, %54 : vector<64x128xf32>
    %cst_29 = arith.constant 0.000000e+00 : f32
    %56 = vector.broadcast %cst_29 : f32 to vector<64x128xf32>
    %57 = arith.maximumf %55, %56 : vector<64x128xf32>
    %cst_30 = arith.constant dense<0.000000e+00> : vector<8x128xf32>
    %58 = tpu.matmul %7, %57, %cst_30 {dimension_numbers = #tpu.dot_dimension_numbers<[1], [0], [0], [1], [0, 0, 1, 1], [], []>} : vector<8x64xf32>, vector<64x128xf32>, vector<8x128xf32> -> vector<8x128xf32>
    %59 = vector.broadcast %8 : vector<8x1xf32> to vector<8x128xf32>
    %60 = arith.addf %58, %59 : vector<8x128xf32>
    %61 = vector.extract_strided_slice %60 {offsets = [0, 0], sizes = [2, 128], strides = [1, 1]} : vector<8x128xf32> to vector<2x128xf32>
    %cst_31 = arith.constant 1.000000e+01 : f32
    %62 = vector.broadcast %cst_31 : f32 to vector<2x128xf32>
    %63 = arith.mulf %61, %62 : vector<2x128xf32>
    %64 = math.absf %63 : vector<2x128xf32>
    %cst_32 = arith.constant 2.41421366 : f32
    %65 = vector.broadcast %cst_32 : f32 to vector<2x128xf32>
    %66 = arith.cmpf ogt, %64, %65 : vector<2x128xf32>
    %cst_33 = arith.constant 0.414213568 : f32
    %67 = vector.broadcast %cst_33 : f32 to vector<2x128xf32>
    %68 = arith.cmpf ogt, %64, %67 : vector<2x128xf32>
    %cst_34 = arith.constant -1.000000e+00 : f32
    %69 = vector.broadcast %cst_34 : f32 to vector<2x128xf32>
    %70 = arith.divf %69, %64 : vector<2x128xf32>
    %cst_35 = arith.constant 1.000000e+00 : f32
    %71 = vector.broadcast %cst_35 : f32 to vector<2x128xf32>
    %72 = arith.subf %64, %71 : vector<2x128xf32>
    %cst_36 = arith.constant 1.000000e+00 : f32
    %73 = vector.broadcast %cst_36 : f32 to vector<2x128xf32>
    %74 = arith.addf %64, %73 : vector<2x128xf32>
    %75 = arith.divf %72, %74 : vector<2x128xf32>
    %76 = arith.select %68, %75, %64 : vector<2x128xi1>, vector<2x128xf32>
    %77 = arith.select %66, %70, %76 : vector<2x128xi1>, vector<2x128xf32>
    %cst_37 = arith.constant 0.785398185 : f32
    %cst_38 = arith.constant 0.000000e+00 : f32
    %78 = vector.broadcast %cst_37 : f32 to vector<2x128xf32>
    %79 = vector.broadcast %cst_38 : f32 to vector<2x128xf32>
    %80 = arith.select %68, %78, %79 : vector<2x128xi1>, vector<2x128xf32>
    %cst_39 = arith.constant 1.57079637 : f32
    %81 = vector.broadcast %cst_39 : f32 to vector<2x128xf32>
    %82 = arith.select %66, %81, %80 : vector<2x128xi1>, vector<2x128xf32>
    %83 = arith.mulf %77, %77 : vector<2x128xf32>
    %cst_40 = arith.constant 0.0805374458 : f32
    %84 = vector.broadcast %cst_40 : f32 to vector<2x128xf32>
    %85 = arith.mulf %84, %83 : vector<2x128xf32>
    %cst_41 = arith.constant 0.138776854 : f32
    %86 = vector.broadcast %cst_41 : f32 to vector<2x128xf32>
    %87 = arith.subf %85, %86 : vector<2x128xf32>
    %88 = arith.mulf %87, %83 : vector<2x128xf32>
    %cst_42 = arith.constant 0.199777111 : f32
    %89 = vector.broadcast %cst_42 : f32 to vector<2x128xf32>
    %90 = arith.addf %88, %89 : vector<2x128xf32>
    %91 = arith.mulf %90, %83 : vector<2x128xf32>
    %cst_43 = arith.constant 0.333329499 : f32
    %92 = vector.broadcast %cst_43 : f32 to vector<2x128xf32>
    %93 = arith.subf %91, %92 : vector<2x128xf32>
    %94 = arith.mulf %77, %83 : vector<2x128xf32>
    %95 = arith.mulf %94, %93 : vector<2x128xf32>
    %96 = arith.addf %82, %95 : vector<2x128xf32>
    %97 = arith.addf %96, %77 : vector<2x128xf32>
    %cst_44 = arith.constant 0.000000e+00 : f32
    %98 = vector.broadcast %cst_44 : f32 to vector<2x128xf32>
    %99 = arith.cmpf olt, %63, %98 : vector<2x128xf32>
    %cst_45 = arith.constant 0.000000e+00 : f32
    %100 = vector.broadcast %cst_45 : f32 to vector<2x128xf32>
    %101 = arith.subf %100, %97 : vector<2x128xf32>
    %102 = arith.select %99, %101, %97 : vector<2x128xi1>, vector<2x128xf32>
    %cst_46 = arith.constant 0.318309873 : f32
    %103 = vector.broadcast %cst_46 : f32 to vector<2x128xf32>
    %104 = arith.mulf %102, %103 : vector<2x128xf32>
    %cst_47 = arith.constant 5.000000e-01 : f32
    %105 = vector.broadcast %cst_47 : f32 to vector<2x128xf32>
    %106 = arith.addf %105, %104 : vector<2x128xf32>
    %107 = vector.extract_strided_slice %60 {offsets = [2, 0], sizes = [4, 128], strides = [1, 1]} : vector<8x128xf32> to vector<4x128xf32>
    %108 = arith.negf %107 : vector<4x128xf32>
    %109 = math.exp %108 : vector<4x128xf32>
    %cst_48 = arith.constant 1.000000e+00 : f32
    %110 = vector.broadcast %cst_48 : f32 to vector<4x128xf32>
    %111 = arith.addf %110, %109 : vector<4x128xf32>
    %112 = arith.divf %110, %111 : vector<4x128xf32>
    %113 = vector.extract_strided_slice %112 {offsets = [0, 0], sizes = [2, 128], strides = [1, 1]} : vector<4x128xf32> to vector<2x128xf32>
    %114 = arith.mulf %113, %106 : vector<2x128xf32>
    %115 = vector.extract_strided_slice %112 {offsets = [2, 0], sizes = [2, 128], strides = [1, 1]} : vector<4x128xf32> to vector<2x128xf32>
    %cst_49 = arith.constant 1.000000e+00 : f32
    %116 = vector.broadcast %cst_49 : f32 to vector<2x128xf32>
    %117 = arith.subf %116, %106 : vector<2x128xf32>
    %118 = arith.mulf %115, %117 : vector<2x128xf32>
    %119 = arith.addf %114, %118 : vector<2x128xf32>
    %120 = vector.extract_strided_slice %119 {offsets = [0, 0], sizes = [1, 128], strides = [1, 1]} : vector<2x128xf32> to vector<1x128xf32>
    %121 = vector.extract_strided_slice %119 {offsets = [1, 0], sizes = [1, 128], strides = [1, 1]} : vector<2x128xf32> to vector<1x128xf32>
    %122 = arith.subf %1, %120 : vector<1x128xf32>
    %123 = arith.addf %1, %121 : vector<1x128xf32>
    %124 = tpu.concatenate %122, %123 in 0 : vector<1x128xf32>, vector<1x128xf32> -> vector<2x128xf32>
    %125 = vector.extract_strided_slice %0 {offsets = [1, 0], sizes = [6, 128], strides = [1, 1]} : vector<8x128xf32> to vector<6x128xf32>
    %126 = tpu.concatenate %124, %125 in 0 : vector<2x128xf32>, vector<6x128xf32> -> vector<8x128xf32>
    %c0_50 = arith.constant 0 : index
    %c0_51 = arith.constant 0 : index
    %127 = vector.load %arg2[%c0_50, %c0_51] : memref<64x8xf32, #tpu.memory_space<vmem>>, vector<64x8xf32>
    %cst_52 = arith.constant dense<0.000000e+00> : vector<64x128xf32>
    %128 = tpu.matmul %127, %126, %cst_52 {dimension_numbers = #tpu.dot_dimension_numbers<[1], [0], [0], [1], [0, 0, 1, 1], [], []>} : vector<64x8xf32>, vector<8x128xf32>, vector<64x128xf32> -> vector<64x128xf32>
    %cst_53 = arith.constant dense<0.000000e+00> : vector<64xf32>
    %129 = vector.multi_reduction <add>, %128, %cst_53 [1] : vector<64x128xf32> to vector<64xf32>
    %130 = vector.shape_cast %129 : vector<64xf32> to vector<64x1xf32>
    %cst_54 = arith.constant 7.812500e-03 : f32
    %131 = vector.broadcast %cst_54 : f32 to vector<64x1xf32>
    %132 = arith.mulf %130, %131 : vector<64x1xf32>
    %133 = arith.mulf %128, %128 : vector<64x128xf32>
    %cst_55 = arith.constant dense<0.000000e+00> : vector<64xf32>
    %134 = vector.multi_reduction <add>, %133, %cst_55 [1] : vector<64x128xf32> to vector<64xf32>
    %135 = vector.shape_cast %134 : vector<64xf32> to vector<64x1xf32>
    %cst_56 = arith.constant 7.812500e-03 : f32
    %136 = vector.broadcast %cst_56 : f32 to vector<64x1xf32>
    %137 = arith.mulf %135, %136 : vector<64x1xf32>
    %138 = arith.mulf %132, %132 : vector<64x1xf32>
    %139 = arith.subf %137, %138 : vector<64x1xf32>
    %cst_57 = arith.constant 9.99999974E-6 : f32
    %140 = vector.broadcast %cst_57 : f32 to vector<64x1xf32>
    %141 = arith.addf %139, %140 : vector<64x1xf32>
    %142 = math.rsqrt %141 : vector<64x1xf32>
    %143 = arith.mulf %2, %142 : vector<64x1xf32>
    %144 = arith.mulf %132, %143 : vector<64x1xf32>
    %145 = arith.subf %3, %144 : vector<64x1xf32>
    %146 = vector.broadcast %143 : vector<64x1xf32> to vector<64x128xf32>
    %147 = arith.mulf %128, %146 : vector<64x128xf32>
    %148 = vector.broadcast %145 : vector<64x1xf32> to vector<64x128xf32>
    %149 = arith.addf %147, %148 : vector<64x128xf32>
    %cst_58 = arith.constant 0.000000e+00 : f32
    %150 = vector.broadcast %cst_58 : f32 to vector<64x128xf32>
    %151 = arith.maximumf %149, %150 : vector<64x128xf32>
    %cst_59 = arith.constant dense<0.000000e+00> : vector<64x128xf32>
    %152 = tpu.matmul %6, %151, %cst_59 {dimension_numbers = #tpu.dot_dimension_numbers<[1], [0], [0], [1], [0, 0, 1, 1], [], []>} : vector<64x64xf32>, vector<64x128xf32>, vector<64x128xf32> -> vector<64x128xf32>
    %cst_60 = arith.constant dense<0.000000e+00> : vector<64xf32>
    %153 = vector.multi_reduction <add>, %152, %cst_60 [1] : vector<64x128xf32> to vector<64xf32>
    %154 = vector.shape_cast %153 : vector<64xf32> to vector<64x1xf32>
    %cst_61 = arith.constant 7.812500e-03 : f32
    %155 = vector.broadcast %cst_61 : f32 to vector<64x1xf32>
    %156 = arith.mulf %154, %155 : vector<64x1xf32>
    %157 = arith.mulf %152, %152 : vector<64x128xf32>
    %cst_62 = arith.constant dense<0.000000e+00> : vector<64xf32>
    %158 = vector.multi_reduction <add>, %157, %cst_62 [1] : vector<64x128xf32> to vector<64xf32>
    %159 = vector.shape_cast %158 : vector<64xf32> to vector<64x1xf32>
    %cst_63 = arith.constant 7.812500e-03 : f32
    %160 = vector.broadcast %cst_63 : f32 to vector<64x1xf32>
    %161 = arith.mulf %159, %160 : vector<64x1xf32>
    %162 = arith.mulf %156, %156 : vector<64x1xf32>
    %163 = arith.subf %161, %162 : vector<64x1xf32>
    %cst_64 = arith.constant 9.99999974E-6 : f32
    %164 = vector.broadcast %cst_64 : f32 to vector<64x1xf32>
    %165 = arith.addf %163, %164 : vector<64x1xf32>
    %166 = math.rsqrt %165 : vector<64x1xf32>
    %167 = arith.mulf %4, %166 : vector<64x1xf32>
    %168 = arith.mulf %156, %167 : vector<64x1xf32>
    %169 = arith.subf %5, %168 : vector<64x1xf32>
    %170 = vector.broadcast %167 : vector<64x1xf32> to vector<64x128xf32>
    %171 = arith.mulf %152, %170 : vector<64x128xf32>
    %172 = vector.broadcast %169 : vector<64x1xf32> to vector<64x128xf32>
    %173 = arith.addf %171, %172 : vector<64x128xf32>
    %cst_65 = arith.constant 0.000000e+00 : f32
    %174 = vector.broadcast %cst_65 : f32 to vector<64x128xf32>
    %175 = arith.maximumf %173, %174 : vector<64x128xf32>
    %cst_66 = arith.constant dense<0.000000e+00> : vector<8x128xf32>
    %176 = tpu.matmul %7, %175, %cst_66 {dimension_numbers = #tpu.dot_dimension_numbers<[1], [0], [0], [1], [0, 0, 1, 1], [], []>} : vector<8x64xf32>, vector<64x128xf32>, vector<8x128xf32> -> vector<8x128xf32>
    %177 = vector.broadcast %8 : vector<8x1xf32> to vector<8x128xf32>
    %178 = arith.addf %176, %177 : vector<8x128xf32>
    %179 = vector.extract_strided_slice %178 {offsets = [0, 0], sizes = [2, 128], strides = [1, 1]} : vector<8x128xf32> to vector<2x128xf32>
    %cst_67 = arith.constant 1.000000e+01 : f32
    %180 = vector.broadcast %cst_67 : f32 to vector<2x128xf32>
    %181 = arith.mulf %179, %180 : vector<2x128xf32>
    %182 = math.absf %181 : vector<2x128xf32>
    %cst_68 = arith.constant 2.41421366 : f32
    %183 = vector.broadcast %cst_68 : f32 to vector<2x128xf32>
    %184 = arith.cmpf ogt, %182, %183 : vector<2x128xf32>
    %cst_69 = arith.constant 0.414213568 : f32
    %185 = vector.broadcast %cst_69 : f32 to vector<2x128xf32>
    %186 = arith.cmpf ogt, %182, %185 : vector<2x128xf32>
    %cst_70 = arith.constant -1.000000e+00 : f32
    %187 = vector.broadcast %cst_70 : f32 to vector<2x128xf32>
    %188 = arith.divf %187, %182 : vector<2x128xf32>
    %cst_71 = arith.constant 1.000000e+00 : f32
    %189 = vector.broadcast %cst_71 : f32 to vector<2x128xf32>
    %190 = arith.subf %182, %189 : vector<2x128xf32>
    %cst_72 = arith.constant 1.000000e+00 : f32
    %191 = vector.broadcast %cst_72 : f32 to vector<2x128xf32>
    %192 = arith.addf %182, %191 : vector<2x128xf32>
    %193 = arith.divf %190, %192 : vector<2x128xf32>
    %194 = arith.select %186, %193, %182 : vector<2x128xi1>, vector<2x128xf32>
    %195 = arith.select %184, %188, %194 : vector<2x128xi1>, vector<2x128xf32>
    %cst_73 = arith.constant 0.785398185 : f32
    %cst_74 = arith.constant 0.000000e+00 : f32
    %196 = vector.broadcast %cst_73 : f32 to vector<2x128xf32>
    %197 = vector.broadcast %cst_74 : f32 to vector<2x128xf32>
    %198 = arith.select %186, %196, %197 : vector<2x128xi1>, vector<2x128xf32>
    %cst_75 = arith.constant 1.57079637 : f32
    %199 = vector.broadcast %cst_75 : f32 to vector<2x128xf32>
    %200 = arith.select %184, %199, %198 : vector<2x128xi1>, vector<2x128xf32>
    %201 = arith.mulf %195, %195 : vector<2x128xf32>
    %cst_76 = arith.constant 0.0805374458 : f32
    %202 = vector.broadcast %cst_76 : f32 to vector<2x128xf32>
    %203 = arith.mulf %202, %201 : vector<2x128xf32>
    %cst_77 = arith.constant 0.138776854 : f32
    %204 = vector.broadcast %cst_77 : f32 to vector<2x128xf32>
    %205 = arith.subf %203, %204 : vector<2x128xf32>
    %206 = arith.mulf %205, %201 : vector<2x128xf32>
    %cst_78 = arith.constant 0.199777111 : f32
    %207 = vector.broadcast %cst_78 : f32 to vector<2x128xf32>
    %208 = arith.addf %206, %207 : vector<2x128xf32>
    %209 = arith.mulf %208, %201 : vector<2x128xf32>
    %cst_79 = arith.constant 0.333329499 : f32
    %210 = vector.broadcast %cst_79 : f32 to vector<2x128xf32>
    %211 = arith.subf %209, %210 : vector<2x128xf32>
    %212 = arith.mulf %195, %201 : vector<2x128xf32>
    %213 = arith.mulf %212, %211 : vector<2x128xf32>
    %214 = arith.addf %200, %213 : vector<2x128xf32>
    %215 = arith.addf %214, %195 : vector<2x128xf32>
    %cst_80 = arith.constant 0.000000e+00 : f32
    %216 = vector.broadcast %cst_80 : f32 to vector<2x128xf32>
    %217 = arith.cmpf olt, %181, %216 : vector<2x128xf32>
    %cst_81 = arith.constant 0.000000e+00 : f32
    %218 = vector.broadcast %cst_81 : f32 to vector<2x128xf32>
    %219 = arith.subf %218, %215 : vector<2x128xf32>
    %220 = arith.select %217, %219, %215 : vector<2x128xi1>, vector<2x128xf32>
    %cst_82 = arith.constant 0.318309873 : f32
    %221 = vector.broadcast %cst_82 : f32 to vector<2x128xf32>
    %222 = arith.mulf %220, %221 : vector<2x128xf32>
    %cst_83 = arith.constant 5.000000e-01 : f32
    %223 = vector.broadcast %cst_83 : f32 to vector<2x128xf32>
    %224 = arith.addf %223, %222 : vector<2x128xf32>
    %225 = vector.extract_strided_slice %178 {offsets = [2, 0], sizes = [4, 128], strides = [1, 1]} : vector<8x128xf32> to vector<4x128xf32>
    %226 = arith.negf %225 : vector<4x128xf32>
    %227 = math.exp %226 : vector<4x128xf32>
    %cst_84 = arith.constant 1.000000e+00 : f32
    %228 = vector.broadcast %cst_84 : f32 to vector<4x128xf32>
    %229 = arith.addf %228, %227 : vector<4x128xf32>
    %230 = arith.divf %228, %229 : vector<4x128xf32>
    %231 = vector.extract_strided_slice %230 {offsets = [0, 0], sizes = [2, 128], strides = [1, 1]} : vector<4x128xf32> to vector<2x128xf32>
    %232 = arith.mulf %231, %224 : vector<2x128xf32>
    %233 = vector.extract_strided_slice %230 {offsets = [2, 0], sizes = [2, 128], strides = [1, 1]} : vector<4x128xf32> to vector<2x128xf32>
    %cst_85 = arith.constant 1.000000e+00 : f32
    %234 = vector.broadcast %cst_85 : f32 to vector<2x128xf32>
    %235 = arith.subf %234, %224 : vector<2x128xf32>
    %236 = arith.mulf %233, %235 : vector<2x128xf32>
    %237 = arith.addf %232, %236 : vector<2x128xf32>
    %238 = vector.extract_strided_slice %237 {offsets = [1, 0], sizes = [1, 128], strides = [1, 1]} : vector<2x128xf32> to vector<1x128xf32>
    %239 = arith.subf %120, %238 : vector<1x128xf32>
    %240 = vector.extract_strided_slice %237 {offsets = [0, 0], sizes = [1, 128], strides = [1, 1]} : vector<2x128xf32> to vector<1x128xf32>
    %241 = arith.subf %121, %240 : vector<1x128xf32>
    %242 = tpu.concatenate %239, %241 in 0 : vector<1x128xf32>, vector<1x128xf32> -> vector<2x128xf32>
    %243 = math.absf %242 : vector<2x128xf32>
    %cst_86 = arith.constant 0.000000e+00 : f32
    %244 = vector.broadcast %cst_86 : f32 to vector<2x128xf32>
    %245 = arith.subf %244, %243 : vector<2x128xf32>
    %246 = math.exp %245 : vector<2x128xf32>
    %cst_87 = arith.constant 9.950000e-01 : f32
    %247 = vector.broadcast %cst_87 : f32 to vector<2x128xf32>
    %248 = arith.mulf %247, %246 : vector<2x128xf32>
    %cst_88 = arith.constant 5.000000e-03 : f32
    %249 = vector.broadcast %cst_88 : f32 to vector<2x128xf32>
    %250 = arith.addf %249, %248 : vector<2x128xf32>
    %251 = math.log %250 : vector<2x128xf32>
    %cst_89 = arith.constant 0.000000e+00 : f32
    %252 = vector.broadcast %cst_89 : f32 to vector<2x128xf32>
    %253 = arith.subf %252, %251 : vector<2x128xf32>
    %c0_90 = arith.constant 0 : index
    %c0_91 = arith.constant 0 : index
    %254 = vector.load %arg10[%c0_90, %c0_91] : memref<24x8xf32, #tpu.memory_space<vmem>>, vector<24x8xf32>
    %cst_92 = arith.constant dense<0.000000e+00> : vector<24x128xf32>
    %255 = tpu.matmul %254, %0, %cst_92 {dimension_numbers = #tpu.dot_dimension_numbers<[1], [0], [0], [1], [0, 0, 1, 1], [], []>} : vector<24x8xf32>, vector<8x128xf32>, vector<24x128xf32> -> vector<24x128xf32>
    %c0_93 = arith.constant 0 : index
    %c0_94 = arith.constant 0 : index
    %256 = vector.load %arg11[%c0_93, %c0_94] : memref<24x1xf32, #tpu.memory_space<vmem>>, vector<24x1xf32>
    %c0_95 = arith.constant 0 : index
    %c0_96 = arith.constant 0 : index
    %257 = vector.load %arg12[%c0_95, %c0_96] : memref<24x1xf32, #tpu.memory_space<vmem>>, vector<24x1xf32>
    %cst_97 = arith.constant dense<0.000000e+00> : vector<24xf32>
    %258 = vector.multi_reduction <add>, %255, %cst_97 [1] : vector<24x128xf32> to vector<24xf32>
    %259 = vector.shape_cast %258 : vector<24xf32> to vector<24x1xf32>
    %cst_98 = arith.constant 7.812500e-03 : f32
    %260 = vector.broadcast %cst_98 : f32 to vector<24x1xf32>
    %261 = arith.mulf %259, %260 : vector<24x1xf32>
    %262 = arith.mulf %255, %255 : vector<24x128xf32>
    %cst_99 = arith.constant dense<0.000000e+00> : vector<24xf32>
    %263 = vector.multi_reduction <add>, %262, %cst_99 [1] : vector<24x128xf32> to vector<24xf32>
    %264 = vector.shape_cast %263 : vector<24xf32> to vector<24x1xf32>
    %cst_100 = arith.constant 7.812500e-03 : f32
    %265 = vector.broadcast %cst_100 : f32 to vector<24x1xf32>
    %266 = arith.mulf %264, %265 : vector<24x1xf32>
    %267 = arith.mulf %261, %261 : vector<24x1xf32>
    %268 = arith.subf %266, %267 : vector<24x1xf32>
    %cst_101 = arith.constant 9.99999974E-6 : f32
    %269 = vector.broadcast %cst_101 : f32 to vector<24x1xf32>
    %270 = arith.addf %268, %269 : vector<24x1xf32>
    %271 = math.rsqrt %270 : vector<24x1xf32>
    %272 = arith.mulf %256, %271 : vector<24x1xf32>
    %273 = arith.mulf %261, %272 : vector<24x1xf32>
    %274 = arith.subf %257, %273 : vector<24x1xf32>
    %275 = vector.broadcast %272 : vector<24x1xf32> to vector<24x128xf32>
    %276 = arith.mulf %255, %275 : vector<24x128xf32>
    %277 = vector.broadcast %274 : vector<24x1xf32> to vector<24x128xf32>
    %278 = arith.addf %276, %277 : vector<24x128xf32>
    %cst_102 = arith.constant 0.000000e+00 : f32
    %279 = vector.broadcast %cst_102 : f32 to vector<24x128xf32>
    %280 = arith.maximumf %278, %279 : vector<24x128xf32>
    %c0_103 = arith.constant 0 : index
    %c0_104 = arith.constant 0 : index
    %281 = vector.load %arg13[%c0_103, %c0_104] : memref<8x24xf32, #tpu.memory_space<vmem>>, vector<8x24xf32>
    %cst_105 = arith.constant dense<0.000000e+00> : vector<8x128xf32>
    %282 = tpu.matmul %281, %280, %cst_105 {dimension_numbers = #tpu.dot_dimension_numbers<[1], [0], [0], [1], [0, 0, 1, 1], [], []>} : vector<8x24xf32>, vector<24x128xf32>, vector<8x128xf32> -> vector<8x128xf32>
    %c0_106 = arith.constant 0 : index
    %c0_107 = arith.constant 0 : index
    %283 = vector.load %arg14[%c0_106, %c0_107] : memref<8x1xf32, #tpu.memory_space<vmem>>, vector<8x1xf32>
    %284 = vector.broadcast %283 : vector<8x1xf32> to vector<8x128xf32>
    %285 = arith.addf %282, %284 : vector<8x128xf32>
    %286 = arith.negf %285 : vector<8x128xf32>
    %287 = math.exp %286 : vector<8x128xf32>
    %cst_108 = arith.constant 1.000000e+00 : f32
    %288 = vector.broadcast %cst_108 : f32 to vector<8x128xf32>
    %289 = arith.addf %288, %287 : vector<8x128xf32>
    %290 = arith.divf %288, %289 : vector<8x128xf32>
    %cst_109 = arith.constant 0.000000e+00 : f32
    %291 = vector.broadcast %cst_109 : f32 to vector<6x128xf32>
    %292 = vector.extract_strided_slice %60 {offsets = [0, 0], sizes = [2, 128], strides = [1, 1]} : vector<8x128xf32> to vector<2x128xf32>
    %293 = vector.extract_strided_slice %290 {offsets = [0, 0], sizes = [2, 128], strides = [1, 1]} : vector<8x128xf32> to vector<2x128xf32>
    %294 = tpu.concatenate %253, %124, %292, %119, %293, %291 in 0 : vector<2x128xf32>, vector<2x128xf32>, vector<2x128xf32>, vector<2x128xf32>, vector<2x128xf32>, vector<6x128xf32> -> vector<16x128xf32>
    %c0_110 = arith.constant 0 : index
    %c0_111 = arith.constant 0 : index
    %295 = vector.load %arg15[%c0_110, %c0_111] : memref<16x128xf32, #tpu.memory_space<vmem>>, vector<16x128xf32>
    tpu.vector_store %arg15[%c0_110, %c0_111], %294 {strides = array<i32>} : memref<16x128xf32, #tpu.memory_space<vmem>>, vector<16x128xf32>,
    return
  }
}

</mosaic_0001>

<bundles_post_ra>
// kernel: tpu_custom_call.1
= control target key start
LH: loop header
LB: loop body
LE: loop exit
PB: predicated region body
PF: predicated region fallthrough
CT: control target
= control target key end

     0   :  { %vm102_vm0 = vcmask 64512   ;;  %s3387_s0 = inlined_call_operand.vmem [shape: f32[8,128], index: 0, kind: input, shape index: {}]   ;;  %s3388_s1 = inlined_call_operand.vmem [shape: f32[64,8], index: 1, kind: input, shape index: {}]   ;;  %s3389_s2 = inlined_call_operand.vmem [shape: f32[64,8], index: 2, kind: input, shape index: {}]   ;;  %s3390_s3 = inlined_call_operand.vmem [shape: f32[64,1], index: 3, kind: input, shape index: {}]   ;;  %s3391_s4 = inlined_call_operand.vmem [shape: f32[64,1], index: 4, kind: input, shape index: {}]   ;;  %s3392_s5 = inlined_call_operand.vmem [shape: f32[64,64], index: 5, kind: input, shape index: {}]   ;;  %s3393_s6 = inlined_call_operand.vmem [shape: f32[64,1], index: 6, kind: input, shape index: {}]   ;;  %s3394_s7 = inlined_call_operand.vmem [shape: f32[64,1], index: 7, kind: input, shape index: {}]   ;;  %s3395_s8 = inlined_call_operand.vmem [shape: f32[8,64], index: 8, kind: input, shape index: {}]   ;;  %s3396_s9 = inlined_call_operand.vmem [shape: f32[8,1], index: 9, kind: input, shape index: {}]   ;;  %s3397_s10 = inlined_call_operand.vmem [shape: f32[24,8], index: 10, kind: input, shape index: {}]   ;;  %s3398_s11 = inlined_call_operand.vmem [shape: f32[24,1], index: 11, kind: input, shape index: {}]   ;;  %s3399_s12 = inlined_call_operand.vmem [shape: f32[24,1], index: 12, kind: input, shape index: {}]   ;;  %s3400_s13 = inlined_call_operand.vmem [shape: f32[8,24], index: 13, kind: input, shape index: {}]   ;;  %s3401_s14 = inlined_call_operand.vmem [shape: f32[8,1], index: 14, kind: input, shape index: {}]   ;;  %s3402_s15 = inlined_call_operand.hbm [shape: f32[16,128], index: 15, kind: output, shape index: {}]  }
   0x1   :  { %v51_v0 = vld [vmem:[%s3387_s0] sm:$0xff]  ;;  %v95_v2 = vld [vmem:[%s3388_s1 + $0x8] sm:$0xff]  ;;  %v96_v3 = vld [vmem:[%s3388_s1 + $0x10] sm:$0xff] }
   0x2   :  { %v94_v1 = vld [vmem:[%s3388_s1] sm:$0xff]  ;;  %2175 = vmatprep.subr.mxu0 %v51_v0 }
   0x3   :  { %2177 = vmatprep.mubr.msk.f32.mxu0 %vm102_vm0, %v94_v1  ;;  %2176 = vmatpush3.msra.mxu0 %v51_v0 }
   0x4   :  { %2178 = vmatmul.mubr.msk.f32.vlgmr.msra.gmra.mrb[0].mxu0 %vm102_vm0, %v95_v2 }
   0x5   :  { %20 = vsyncpa [#allocation3], 0  ;;  %2180 = vmatprep.mubr.msk.f32.mxu0 %vm102_vm0, %v96_v3  ;;  %v97_v4 = vld [vmem:[%s3388_s1 + $0x18] sm:$0xff]  ;;  %v98_v5 = vld [vmem:[%s3388_s1 + $0x20] sm:$0xff]  ;;  %v2519_v25 = vmov 0   ;;  %vm448_vm1 = vcmask 523264  }
   0x6   :  { %v99_v6 = vld [vmem:[%s3388_s1 + $0x28] sm:$0xff]  ;;  %v100_v7 = vld [vmem:[%s3388_s1 + $0x30] sm:$0xff]  ;;  %v101_v8 = vld [vmem:[%s3388_s1 + $0x38] sm:$0xff]  ;;  %2383 = vset.pattern.permute.xlu1 %v2519_v25  ;;  %2384 = vset.pattern.permute.xlu0 %v2519_v25  ;;  %vm2521_vm2 = vmmov 0   ;;  %vm931_vm6 = vcmask 1040384   ;;  %vm936_vm7 = vcmask 1041408  }
   0x7   :  { %v53_v52 = vld [vmem:[%s3390_s3 + $0x8] sm:$0xff]  ;;  %v52_v63 = vld [vmem:[%s3390_s3] sm:$0xff]  ;;  %vm2029_vm11 = vcmask 1043456   ;;  %vm2031_vm12 = vcmask 1045504   ;;  %vm1940_vm13 = vcmask 195584  }
   0x8   :  { %2181 = vmatmul.mubr.msk.f32.gmra.mrb[2].mxu0 %vm102_vm0, %v97_v4  ;;  %v61_v62 = vld [vmem:[%s3391_s4 + $0x8] sm:$0xff] }
   0x9   :  { %2183 = vmatprep.mubr.msk.f32.mxu0 %vm102_vm0, %v98_v5 }
   0xc   :  { %2184 = vmatmul.mubr.msk.f32.gmra.mrb[4].mxu0 %vm102_vm0, %v99_v6 }
   0xd   :  { %2186 = vmatprep.mubr.msk.f32.mxu0 %vm102_vm0, %v100_v7 }
  0x10   :  { %2187 = vmatmul.mubr.msk.f32.gmra.mrb[6].mxu0 %vm102_vm0, %v101_v8 }
  0xd7   :  { %v2641_v9 = vpop.f32.mrb[0].mxu0 }
  0xd8   :  { %234 = vadd.xlane.f32.xlu0 %v2641_v9  ;;  %v2644_v10 = vpop.f32.mrb[1].mxu0  ;;  %v257_v11 = vmul.f32 %v2641_v9, %v2641_v9 }
  0xd9   :  { %v256_v13 = vmul.f32 %v2644_v10, %v2644_v10 }
  0xda   :  { %266 = vadd.xlane.f32.xlu1 %v257_v11 }
  0xdb   :  { %v2648_v12 = vpop.f32.mrb[2].mxu0 }
  0xdc   :  { %232 = vadd.xlane.f32.xlu0 %v2644_v10  ;;  %v2653_v14 = vpop.f32.mrb[3].mxu0  ;;  %v259_v19 = vmul.f32 %v2648_v12, %v2648_v12 }
  0xdd   :  { %v258_v16 = vmul.f32 %v2653_v14, %v2653_v14 }
  0xde   :  { %264 = vadd.xlane.f32.xlu1 %v256_v13 }
  0xdf   :  { %v2655_v15 = vpop.f32.mrb[4].mxu0 }
  0xe0   :  { %236 = vadd.xlane.f32.xlu0 %v2653_v14  ;;  %v2660_v17 = vpop.f32.mrb[5].mxu0  ;;  %v261_v22 = vmul.f32 %v2655_v15, %v2655_v15 }
  0xe1   :  { %v260_v21 = vmul.f32 %v2660_v17, %v2660_v17 }
  0xe2   :  { %238 = vadd.xlane.f32.xlu1 %v2648_v12 }
  0xe3   :  { %v2663_v18 = vpop.f32.mrb[6].mxu0 }
  0xe4   :  { %268 = vadd.xlane.f32.xlu0 %v258_v16  ;;  %v2667_v20 = vpop.f32.mrb[7].mxu0  ;;  %v263_v24 = vmul.f32 %v2663_v18, %v2663_v18 }
  0xe5   :  { %v262_v23 = vmul.f32 %v2667_v20, %v2667_v20 }
  0xe6   :  { %270 = vadd.xlane.f32.xlu1 %v259_v19 }
  0xe8   :  { %240 = vadd.xlane.f32.xlu0 %v2660_v17 }
  0xea   :  { %242 = vadd.xlane.f32.xlu1 %v2655_v15 }
  0xec   :  { %272 = vadd.xlane.f32.xlu0 %v260_v21 }
  0xee   :  { %274 = vadd.xlane.f32.xlu1 %v261_v22 }
  0xf0   :  { %244 = vadd.xlane.f32.xlu0 %v2667_v20 }
  0xf2   :  { %246 = vadd.xlane.f32.xlu1 %v2663_v18 }
  0xf4   :  { %276 = vadd.xlane.f32.xlu0 %v262_v23 }
  0xf6   :  { %278 = vadd.xlane.f32.xlu1 %v263_v24 }
 0x165   :  { %v235_v26 = vpop.xlane.xlu0 %234 }
 0x166   :  { %v249_v27 = vmul.f32 0.0078125, %v235_v26  ;;  %v55_v26 = vld [vmem:[%s3390_s3 + $0x18] sm:$0xff] }
 0x167   :  { %v267_v28 = vpop.xlane.xlu1 %266 }
 0x168   :  { %v289_v29 = vmul.f32 %v249_v27, %v249_v27  ;;  %v281_v30 = vmul.f32 0.0078125, %v267_v28 }
 0x169   :  { %v233_v31 = vpop.xlane.xlu0 %232 }
 0x16a   :  { %v297_v32 = vsub.f32 %v281_v30, %v289_v29  ;;  %v2681_v33 = vmul.f32 0.0078125, %v233_v31 }
 0x16b   :  { %v265_v34 = vpop.xlane.xlu1 %264 }
 0x16c   :  { %v305_v35 = vadd.f32 1e-05, %v297_v32  ;;  %v288_v36 = vmul.f32 %v2681_v33, %v2681_v33  ;;  %v280_v37 = vmul.f32 0.0078125, %v265_v34 }
 0x16d   :  { %v237_v38 = vpop.xlane.xlu0 %236 }
 0x16e   :  { %2385 = vrsqrt.f32 %v305_v35  ;;  %v296_v39 = vsub.f32 %v280_v37, %v288_v36  ;;  %v2685_v40 = vmul.f32 0.0078125, %v237_v38  ;;  %v60_v37 = vld [vmem:[%s3391_s4] sm:$0xff] }
 0x16f   :  { %v239_v41 = vpop.xlane.xlu1 %238 }
 0x170   :  { %v304_v42 = vadd.f32 1e-05, %v296_v39  ;;  %v2687_v43 = vmul.f32 0.0078125, %v239_v41  ;;  %v290_v45 = vmul.f32 %v2685_v40, %v2685_v40 }
 0x171   :  { %v269_v44 = vpop.xlane.xlu0 %268 }
 0x172   :  { %2387 = vrsqrt.f32 %v304_v42  ;;  %v282_v46 = vmul.f32 0.0078125, %v269_v44  ;;  %v291_v48 = vmul.f32 %v2687_v43, %v2687_v43  ;;  %v2720_v44 = vld [vmem:[%s3390_s3 + $0x10] sm:$0xff] }
 0x173   :  { %v271_v47 = vpop.xlane.xlu1 %270 }
 0x174   :  { %v283_v49 = vmul.f32 0.0078125, %v271_v47  ;;  %v298_v53 = vsub.f32 %v282_v46, %v290_v45 }
 0x175   :  { %v241_v50 = vpop.xlane.xlu0 %240 }
 0x176   :  { %v299_v51 = vsub.f32 %v283_v49, %v291_v48  ;;  %v2696_v57 = vmul.f32 0.0078125, %v241_v50  ;;  %v306_v0 = vadd.f32 1e-05, %v298_v53  ;;  %v63_v50 = vld [vmem:[%s3391_s4 + $0x18] sm:$0xff] }
 0x177   :  { %v243_v54 = vpop.xlane.xlu1 %242 }
 0x178   :  { %v2386_v55 = vpop.eup %2385  ;;  %v307_v56 = vadd.f32 1e-05, %v299_v51  ;;  %v253_v58 = vmul.f32 0.0078125, %v243_v54  ;;  %v292_v4 = vmul.f32 %v2696_v57, %v2696_v57  ;;  %v65_v51 = vld [vmem:[%s3391_s4 + $0x28] sm:$0xff] }
 0x179   :  { %v273_v59 = vpop.xlane.xlu0 %272  ;;  %v321_v60 = vmul.f32 %v2386_v55, %v53_v52 }
 0x17a   :  { %2389 = vrsqrt.f32 %v307_v56  ;;  %v293_v61 = vmul.f32 %v253_v58, %v253_v58  ;;  %v284_v5 = vmul.f32 0.0078125, %v273_v59  ;;  %v59_v59 = vld [vmem:[%s3390_s3 + $0x38] sm:$0xff] }
 0x17b   :  { %v275_v1 = vpop.xlane.xlu1 %274  ;;  %351 = vperm.xlu1 %2383, %v321_v60   ;;  %v329_v2 = vmul.f32 %v321_v60, %v249_v27  ;;  %2391 = vrsqrt.f32 %v306_v0  ;;  %v2745_v60 = vld [vmem:[%s3390_s3 + $0x20] sm:$0xff] }
 0x17c   :  { %v2388_v3 = vpop.eup %2387  ;;  %v285_v6 = vmul.f32 0.0078125, %v275_v1  ;;  %v300_v19 = vsub.f32 %v284_v5, %v292_v4  ;;  %v2756_v4 = vld [vmem:[%s3391_s4 + $0x20] sm:$0xff]  ;;  %v2761_v5 = vld [vmem:[%s3390_s3 + $0x30] sm:$0xff] }
 0x17d   :  { %v245_v7 = vpop.xlane.xlu0 %244  ;;  %v337_v8 = vsub.f32 %v61_v62, %v329_v2  ;;  %v320_v11 = vmul.f32 %v2388_v3, %v52_v63  ;;  %v67_v63 = vld [vmem:[%s3391_s4 + $0x38] sm:$0xff] }
 0x17e   :  { %v301_v13 = vsub.f32 %v285_v6, %v293_v61  ;;  %v2706_v22 = vmul.f32 0.0078125, %v245_v7  ;;  %v308_v29 = vadd.f32 1e-05, %v300_v19 }
 0x17f   :  { %v247_v16 = vpop.xlane.xlu1 %246  ;;  %399 = vperm.xlu1 %2383, %v337_v8   ;;  %346 = vperm.xlu0 %2384, %v320_v11   ;;  %v328_v35 = vmul.f32 %v320_v11, %v2681_v33  ;;  %v57_v33 = vld [vmem:[%s3390_s3 + $0x28] sm:$0xff]  ;;  %v2769_v8 = vld [vmem:[%s3391_s4 + $0x30] sm:$0xff] }
 0x180   :  { %v309_v21 = vadd.f32 1e-05, %v301_v13  ;;  %v255_v23 = vmul.f32 0.0078125, %v247_v16  ;;  %v294_v30 = vmul.f32 %v2706_v22, %v2706_v22  ;;  %v2775_v13 = vld [vmem:[%s3392_s5] sm:$0xff] }
 0x181   :  { %v277_v24 = vpop.xlane.xlu0 %276  ;;  %v336_v42 = vsub.f32 %v60_v37, %v328_v35  ;;  %2205 = vmatprep.mubr.msk.f32.mxu1 %vm448_vm1, %v2775_v13 }
 0x182   :  { %2393 = vrsqrt.f32 %v309_v21  ;;  %v295_v25 = vmul.f32 %v255_v23, %v255_v23  ;;  %v286_v31 = vmul.f32 0.0078125, %v277_v24 }
 0x183   :  { %v279_v27 = vpop.xlane.xlu1 %278  ;;  %2395 = vrsqrt.f32 %v308_v29 }
 0x184   :  { %v2390_v28 = vpop.eup %2389  ;;  %v287_v32 = vmul.f32 0.0078125, %v279_v27  ;;  %v302_v38 = vsub.f32 %v286_v31, %v294_v30 }
 0x185   :  { %v323_v34 = vmul.f32 %v2390_v28, %v55_v26  ;;  %v2392_v41 = vpop.eup %2391 }
 0x186   :  { %v303_v36 = vsub.f32 %v287_v32, %v295_v25  ;;  %v310_v46 = vadd.f32 1e-05, %v302_v38  ;;  %v322_v47 = vmul.f32 %v2392_v41, %v2720_v44 }
 0x187   :  { %361 = vperm.xlu1 %2383, %v323_v34   ;;  %v331_v49 = vmul.f32 %v323_v34, %v2687_v43  ;;  %v2737_v43 = vld [vmem:[%s3391_s4 + $0x10] sm:$0xff] }
 0x188   :  { %v311_v39 = vadd.f32 1e-05, %v303_v36  ;;  %v330_v55 = vmul.f32 %v322_v47, %v2685_v40 }
 0x189   :  { %v339_v53 = vsub.f32 %v63_v50, %v331_v49 }
 0x18a   :  { %2397 = vrsqrt.f32 %v311_v39  ;;  %v338_v40 = vsub.f32 %v2737_v43, %v330_v55 }
 0x18b   :  { %394 = vperm.xlu1 %2383, %v336_v42   ;;  %2399 = vrsqrt.f32 %v310_v46 }
 0x18c   :  { %v2394_v45 = vpop.eup %2393 }
 0x18d   :  { %v325_v48 = vmul.f32 %v2394_v45, %v57_v33  ;;  %v2396_v56 = vpop.eup %2395 }
 0x18e   :  { %v324_v62 = vmul.f32 %v2396_v56, %v2745_v60 }
 0x18f   :  { %356 = vperm.xlu1 %2383, %v322_v47   ;;  %371 = vperm.xlu0 %2384, %v325_v48   ;;  %v333_v52 = vmul.f32 %v325_v48, %v253_v58 }
 0x190   :  { %v332_v2 = vmul.f32 %v324_v62, %v2696_v57 }
 0x191   :  { %v341_v54 = vsub.f32 %v65_v51, %v333_v52 }
 0x192   :  { %v340_v6 = vsub.f32 %v2756_v4, %v332_v2 }
 0x193   :  { %409 = vperm.xlu1 %2383, %v339_v53   ;;  %419 = vperm.xlu0 %2384, %v341_v54  }
 0x194   :  { %v2398_v58 = vpop.eup %2397 }
 0x195   :  { %v327_v61 = vmul.f32 %v2398_v58, %v59_v59  ;;  %v2400_v3 = vpop.eup %2399 }
 0x196   :  { %v326_v7 = vmul.f32 %v2400_v3, %v2761_v5 }
 0x197   :  { %404 = vperm.xlu1 %2383, %v338_v40   ;;  %381 = vperm.xlu0 %2384, %v327_v61   ;;  %v335_v0 = vmul.f32 %v327_v61, %v255_v23  ;;  %v2790_v61 = vld [vmem:[%s3392_s5 + $0x8] sm:$0xff] }
 0x198   :  { %v334_v57 = vmul.f32 %v326_v7, %v2706_v22 }
 0x199   :  { %v343_v1 = vsub.f32 %v67_v63, %v335_v0  ;;  %v2818_v63 = vld [vmem:[%s3392_s5 + $0x28] sm:$0xff]  ;;  %v2823_v0 = vld [vmem:[%s3392_s5 + $0x30] sm:$0xff] }
 0x19a   :  { %v342_v11 = vsub.f32 %v2769_v8, %v334_v57 }
 0x19b   :  { %366 = vperm.xlu1 %2383, %v324_v62   ;;  %429 = vperm.xlu0 %2384, %v343_v1   ;;  %v2809_v62 = vld [vmem:[%s3392_s5 + $0x20] sm:$0xff]  ;;  %v2832_v1 = vld [vmem:[%s3392_s5 + $0x38] sm:$0xff] }
 0x19f   :  { %414 = vperm.xlu1 %2383, %v340_v6  }
 0x1a3   :  { %376 = vperm.xlu1 %2383, %v326_v7  }
 0x1a7   :  { %424 = vperm.xlu1 %2383, %v342_v11  }
 0x1fa   :  { %v352_v16 = vpop.permute.xlu1 %351 }
 0x1fb   :  { %v385_v23 = vmul.f32 %v2641_v9, %v352_v16 }
 0x1fe   :  { %v400_v19 = vpop.permute.xlu1 %399  ;;  %v347_v21 = vpop.permute.xlu0 %346 }
 0x1ff   :  { %v433_v24 = vadd.f32 %v400_v19, %v385_v23  ;;  %v384_v25 = vmul.f32 %v347_v21, %v2644_v10 }
 0x201   :  { %v441_v28 = vmax.f32 %v433_v24, 0.0 }
 0x206   :  { %v362_v22 = vpop.permute.xlu1 %361 }
 0x207   :  { %v387_v35 = vmul.f32 %v2648_v12, %v362_v22 }
 0x20a   :  { %v395_v26 = vpop.permute.xlu1 %394 }
 0x20b   :  { %v432_v27 = vadd.f32 %v395_v26, %v384_v25 }
 0x20d   :  { %v440_v29 = vmax.f32 %v432_v27, 0.0 }
 0x20e   :  { %v357_v30 = vpop.permute.xlu1 %356  ;;  %v372_v32 = vpop.permute.xlu0 %371 }
 0x20f   :  { %v2317_v31 = vpack.c.bf16 %v441_v28, %v440_v29  ;;  %v386_v36 = vmul.f32 %v357_v30, %v2653_v14  ;;  %v389_v33 = vmul.f32 %v2655_v15, %v372_v32 }
 0x211   :  { %2318 = vmatprep.subr.bf16.mxu1 %v2317_v31 }
 0x212   :  { %v410_v34 = vpop.permute.xlu1 %409  ;;  %2320 = vmatpush3.bf16.msra.mxu1 %v2317_v31  ;;  %v420_v38 = vpop.permute.xlu0 %419 }
 0x213   :  { %v435_v37 = vadd.f32 %v410_v34, %v387_v35  ;;  %v437_v47 = vadd.f32 %v420_v38, %v389_v33 }
 0x215   :  { %v443_v41 = vmax.f32 %v435_v37, 0.0  ;;  %v445_v50 = vmax.f32 %v437_v47, 0.0 }
 0x216   :  { %v405_v9 = vpop.permute.xlu1 %404  ;;  %v382_v46 = vpop.permute.xlu0 %381 }
 0x217   :  { %v434_v39 = vadd.f32 %v405_v9, %v386_v36  ;;  %v391_v53 = vmul.f32 %v2663_v18, %v382_v46  ;;  %v2795_v18 = vld [vmem:[%s3392_s5 + $0x10] sm:$0xff] }
 0x219   :  { %v442_v10 = vmax.f32 %v434_v39, 0.0 }
 0x21a   :  { %v367_v42 = vpop.permute.xlu1 %366  ;;  %v430_v51 = vpop.permute.xlu0 %429 }
 0x21b   :  { %v2321_v45 = vpack.c.bf16 %v443_v41, %v442_v10  ;;  %v388_v48 = vmul.f32 %v367_v42, %v2660_v17  ;;  %v439_v55 = vadd.f32 %v430_v51, %v391_v53 }
 0x21d   :  { %2322 = vmatprep.subr.bf16.mxu1 %v2321_v45  ;;  %v447_v58 = vmax.f32 %v439_v55, 0.0 }
 0x21e   :  { %v415_v49 = vpop.permute.xlu1 %414  ;;  %2324 = vmatpush3.bf16.msra.mxu1 %v2321_v45 }
 0x21f   :  { %v436_v12 = vadd.f32 %v415_v49, %v388_v48 }
 0x221   :  { %v444_v14 = vmax.f32 %v436_v12, 0.0 }
 0x222   :  { %v377_v52 = vpop.permute.xlu1 %376 }
 0x223   :  { %v2325_v54 = vpack.c.bf16 %v445_v50, %v444_v14  ;;  %v390_v56 = vmul.f32 %v377_v52, %v2667_v20  ;;  %v2804_v20 = vld [vmem:[%s3392_s5 + $0x18] sm:$0xff] }
 0x225   :  { %2326 = vmatprep.subr.bf16.mxu1 %v2325_v54 }
 0x226   :  { %v425_v15 = vpop.permute.xlu1 %424  ;;  %2328 = vmatpush3.bf16.msra.mxu1 %v2325_v54 }
 0x227   :  { %v438_v59 = vadd.f32 %v425_v15, %v390_v56 }
 0x229   :  { %v446_v17 = vmax.f32 %v438_v59, 0.0 }
 0x22b   :  { %v2329_v40 = vpack.c.bf16 %v447_v58, %v446_v17  ;;  %v68_v58 = vld [vmem:[%s3393_s6] sm:$0xff] }
 0x22d   :  { %2330 = vmatprep.subr.bf16.mxu1 %v2329_v40 }
 0x22e   :  { %2332 = vmatpush3.bf16.msra.mxu1 %v2329_v40  ;;  %v2896_v40 = vld [vmem:[%s3393_s6 + $0x8] sm:$0xff] }
 0x231   :  { %2206 = vmatmul.mubr.msk.f32.vlgmr.msra.gmra.mrb[0].mxu1 %vm448_vm1, %v2790_v61 }
 0x232   :  { %2208 = vmatprep.mubr.msk.f32.mxu1 %vm448_vm1, %v2795_v18 }
 0x235   :  { %2209 = vmatmul.mubr.msk.f32.gmra.mrb[2].mxu1 %vm448_vm1, %v2804_v20 }
 0x236   :  { %2211 = vmatprep.mubr.msk.f32.mxu1 %vm448_vm1, %v2809_v62 }
 0x239   :  { %2212 = vmatmul.mubr.msk.f32.gmra.mrb[4].mxu1 %vm448_vm1, %v2818_v63 }
 0x23a   :  { %2214 = vmatprep.mubr.msk.f32.mxu1 %vm448_vm1, %v2823_v0 }
 0x23d   :  { %2215 = vmatmul.mubr.msk.f32.gmra.mrb[6].mxu1 %vm448_vm1, %v2832_v1 }
 0x23e   :  { %2266 = vmatprep.mubr.msk.f32.mxu1 %vm448_vm1, %v2775_v13 }
 0x304   :  { %v2838_v2 = vpop.f32.mrb[0].mxu1 }
 0x305   :  { %580 = vadd.xlane.f32.xlu0 %v2838_v2  ;;  %v2841_v3 = vpop.f32.mrb[1].mxu1  ;;  %v603_v7 = vmul.f32 %v2838_v2, %v2838_v2 }
 0x306   :  { %578 = vadd.xlane.f32.xlu1 %v2841_v3  ;;  %v602_v6 = vmul.f32 %v2841_v3, %v2841_v3 }
 0x308   :  { %v2848_v57 = vpop.f32.mrb[2].mxu1 }
 0x309   :  { %610 = vadd.xlane.f32.xlu0 %v602_v6  ;;  %v2850_v11 = vpop.f32.mrb[3].mxu1  ;;  %v605_v21 = vmul.f32 %v2848_v57, %v2848_v57 }
 0x30a   :  { %612 = vadd.xlane.f32.xlu1 %v603_v7  ;;  %v604_v19 = vmul.f32 %v2850_v11, %v2850_v11 }
 0x30c   :  { %v2852_v13 = vpop.f32.mrb[4].mxu1 }
 0x30d   :  { %582 = vadd.xlane.f32.xlu0 %v2850_v11  ;;  %v2855_v16 = vpop.f32.mrb[5].mxu1  ;;  %v607_v25 = vmul.f32 %v2852_v13, %v2852_v13 }
 0x30e   :  { %584 = vadd.xlane.f32.xlu1 %v2848_v57  ;;  %v606_v24 = vmul.f32 %v2855_v16, %v2855_v16 }
 0x310   :  { %v2862_v22 = vpop.f32.mrb[6].mxu1 }
 0x311   :  { %614 = vadd.xlane.f32.xlu0 %v604_v19  ;;  %v2864_v23 = vpop.f32.mrb[7].mxu1  ;;  %v609_v27 = vmul.f32 %v2862_v22, %v2862_v22 }
 0x312   :  { %616 = vadd.xlane.f32.xlu1 %v605_v21  ;;  %v608_v26 = vmul.f32 %v2864_v23, %v2864_v23 }
 0x315   :  { %586 = vadd.xlane.f32.xlu0 %v2855_v16 }
 0x316   :  { %588 = vadd.xlane.f32.xlu1 %v2852_v13 }
 0x319   :  { %618 = vadd.xlane.f32.xlu0 %v606_v24 }
 0x31a   :  { %620 = vadd.xlane.f32.xlu1 %v607_v25 }
 0x31d   :  { %590 = vadd.xlane.f32.xlu0 %v2864_v23 }
 0x31e   :  { %592 = vadd.xlane.f32.xlu1 %v2862_v22 }
 0x321   :  { %622 = vadd.xlane.f32.xlu0 %v608_v26 }
 0x322   :  { %624 = vadd.xlane.f32.xlu1 %v609_v27 }
 0x392   :  { %v581_v28 = vpop.xlane.xlu0 %580 }
 0x393   :  { %v579_v29 = vpop.xlane.xlu1 %578  ;;  %v595_v30 = vmul.f32 0.0078125, %v581_v28 }
 0x394   :  { %v594_v31 = vmul.f32 0.0078125, %v579_v29 }
 0x395   :  { %v635_v37 = vmul.f32 %v595_v30, %v595_v30 }
 0x396   :  { %v634_v32 = vmul.f32 %v594_v31, %v594_v31  ;;  %v611_v34 = vpop.xlane.xlu0 %610 }
 0x397   :  { %v626_v35 = vmul.f32 0.0078125, %v611_v34  ;;  %v613_v36 = vpop.xlane.xlu1 %612 }
 0x398   :  { %v627_v38 = vmul.f32 0.0078125, %v613_v36 }
 0x399   :  { %v642_v9 = vsub.f32 %v626_v35, %v634_v32  ;;  %v76_v32 = vld [vmem:[%s3394_s7] sm:$0xff] }
 0x39a   :  { %v643_v39 = vsub.f32 %v627_v38, %v635_v37  ;;  %v583_v41 = vpop.xlane.xlu0 %582  ;;  %v77_v37 = vld [vmem:[%s3394_s7 + $0x8] sm:$0xff] }
 0x39b   :  { %v650_v10 = vadd.f32 1e-05, %v642_v9  ;;  %v2878_v42 = vmul.f32 0.0078125, %v583_v41  ;;  %v585_v33 = vpop.xlane.xlu1 %584 }
 0x39c   :  { %v651_v45 = vadd.f32 1e-05, %v643_v39  ;;  %v2880_v46 = vmul.f32 0.0078125, %v585_v33 }
 0x39d   :  { %2401 = vrsqrt.f32 %v650_v10  ;;  %v636_v48 = vmul.f32 %v2878_v42, %v2878_v42 }
 0x39e   :  { %2403 = vrsqrt.f32 %v651_v45  ;;  %v615_v47 = vpop.xlane.xlu0 %614  ;;  %v637_v50 = vmul.f32 %v2880_v46, %v2880_v46 }
 0x39f   :  { %v628_v49 = vmul.f32 0.0078125, %v615_v47  ;;  %v617_v12 = vpop.xlane.xlu1 %616 }
 0x3a0   :  { %v629_v14 = vmul.f32 0.0078125, %v617_v12 }
 0x3a1   :  { %v644_v51 = vsub.f32 %v628_v49, %v636_v48  ;;  %v71_v49 = vld [vmem:[%s3393_s6 + $0x18] sm:$0xff] }
 0x3a2   :  { %v645_v52 = vsub.f32 %v629_v14, %v637_v50  ;;  %v587_v53 = vpop.xlane.xlu0 %586 }
 0x3a3   :  { %v652_v54 = vadd.f32 1e-05, %v644_v51  ;;  %v2886_v55 = vmul.f32 0.0078125, %v587_v53  ;;  %v589_v56 = vpop.xlane.xlu1 %588 }
 0x3a4   :  { %v653_v15 = vadd.f32 1e-05, %v645_v52  ;;  %v2888_v59 = vmul.f32 0.0078125, %v589_v56 }
 0x3a5   :  { %2405 = vrsqrt.f32 %v652_v54  ;;  %v638_v7 = vmul.f32 %v2886_v55, %v2886_v55 }
 0x3a6   :  { %2407 = vrsqrt.f32 %v653_v15  ;;  %v619_v17 = vpop.xlane.xlu0 %618  ;;  %v639_v25 = vmul.f32 %v2888_v59, %v2888_v59 }
 0x3a7   :  { %v2402_v6 = vpop.eup %2401  ;;  %v630_v19 = vmul.f32 0.0078125, %v619_v17  ;;  %v621_v21 = vpop.xlane.xlu1 %620 }
 0x3a8   :  { %v2404_v24 = vpop.eup %2403  ;;  %v631_v26 = vmul.f32 0.0078125, %v621_v21  ;;  %v666_v27 = vmul.f32 %v2402_v6, %v68_v58  ;;  %v2929_v58 = vld [vmem:[%s3394_s7 + $0x10] sm:$0xff] }
 0x3a9   :  { %v646_v28 = vsub.f32 %v630_v19, %v638_v7  ;;  %v667_v29 = vmul.f32 %v2404_v24, %v2896_v40  ;;  %v79_v7 = vld [vmem:[%s3394_s7 + $0x18] sm:$0xff] }
 0x3aa   :  { %v647_v34 = vsub.f32 %v631_v26, %v639_v25  ;;  %v591_v35 = vpop.xlane.xlu0 %590  ;;  %692 = vperm.xlu0 %2384, %v666_v27   ;;  %v674_v36 = vmul.f32 %v666_v27, %v594_v31  ;;  %v2916_v31 = vld [vmem:[%s3393_s6 + $0x10] sm:$0xff]  ;;  %v3405_v26 = vmov 0.0|0.0  }
 0x3ab   :  { %v654_v38 = vadd.f32 1e-05, %v646_v28  ;;  %v2909_v9 = vmul.f32 0.0078125, %v591_v35  ;;  %v593_v39 = vpop.xlane.xlu1 %592  ;;  %697 = vperm.xlu1 %2383, %v667_v29   ;;  %v675_v41 = vmul.f32 %v667_v29, %v595_v30  ;;  %2333 = vmatprep.subr.bf16.mxu0 %v3405_v26  ;;  %v2946_v28 = vld [vmem:[%s3393_s6 + $0x28] sm:$0xff]  ;;  %v2953_v35 = vld [vmem:[%s3394_s7 + $0x20] sm:$0xff] }
 0x3ac   :  { %v655_v10 = vadd.f32 1e-05, %v647_v34  ;;  %v2911_v33 = vmul.f32 0.0078125, %v593_v39  ;;  %v682_v45 = vsub.f32 %v76_v32, %v674_v36 }
 0x3ad   :  { %2409 = vrsqrt.f32 %v654_v38  ;;  %v683_v47 = vsub.f32 %v77_v37, %v675_v41  ;;  %v640_v30 = vmul.f32 %v2909_v9, %v2909_v9  ;;  %v2959_v37 = vld [vmem:[%s3394_s7 + $0x28] sm:$0xff] }
 0x3ae   :  { %2411 = vrsqrt.f32 %v655_v10  ;;  %v623_v48 = vpop.xlane.xlu0 %622  ;;  %v641_v52 = vmul.f32 %v2911_v33, %v2911_v33  ;;  %v2967_v10 = vld [vmem:[%s3393_s6 + $0x30] sm:$0xff] }
 0x3af   :  { %v2406_v12 = vpop.eup %2405  ;;  %v632_v50 = vmul.f32 0.0078125, %v623_v48  ;;  %740 = vperm.xlu1 %2383, %v682_v45   ;;  %v625_v14 = vpop.xlane.xlu1 %624  ;;  %745 = vperm.xlu0 %2384, %v683_v47  }
 0x3b0   :  { %v2408_v51 = vpop.eup %2407  ;;  %v633_v53 = vmul.f32 0.0078125, %v625_v14  ;;  %v668_v54 = vmul.f32 %v2406_v12, %v2916_v31  ;;  %v2984_v12 = vld [vmem:[%s3394_s7 + $0x38] sm:$0xff] }
 0x3b1   :  { %v648_v56 = vsub.f32 %v632_v50, %v640_v30  ;;  %v669_v15 = vmul.f32 %v2408_v51, %v71_v49  ;;  %v2979_v49 = vld [vmem:[%s3394_s7 + $0x30] sm:$0xff] }
 0x3b2   :  { %v649_v17 = vsub.f32 %v633_v53, %v641_v52  ;;  %v676_v6 = vmul.f32 %v668_v54, %v2878_v42  ;;  %v2941_v42 = vld [vmem:[%s3393_s6 + $0x20] sm:$0xff]  ;;  %v3403_v53 = vmov 0.0  }
 0x3b3   :  { %v656_v19 = vadd.f32 1e-05, %v648_v56  ;;  %702 = vperm.xlu1 %2383, %v668_v54   ;;  %707 = vperm.xlu0 %2384, %v669_v15   ;;  %v677_v21 = vmul.f32 %v669_v15, %v2880_v46  ;;  %v93_v52 = vld [vmem:[%s3396_s9] sm:$0xff] }
 0x3b4   :  { %v657_v24 = vadd.f32 1e-05, %v649_v17  ;;  %v684_v25 = vsub.f32 %v2929_v58, %v676_v6  ;;  %2233 = vmatprep.mubr.msk.f32.mxu0 %vm2521_vm2, %v3403_v53 }
 0x3b5   :  { %2413 = vrsqrt.f32 %v656_v19  ;;  %v685_v27 = vsub.f32 %v79_v7, %v677_v21 }
 0x3b6   :  { %2415 = vrsqrt.f32 %v657_v24 }
 0x3b7   :  { %v2410_v46 = vpop.eup %2409  ;;  %750 = vperm.xlu1 %2383, %v684_v25   ;;  %755 = vperm.xlu0 %2384, %v685_v27  }
 0x3b8   :  { %v2412_v29 = vpop.eup %2411  ;;  %v670_v32 = vmul.f32 %v2410_v46, %v2941_v42 }
 0x3b9   :  { %v671_v34 = vmul.f32 %v2412_v29, %v2946_v28 }
 0x3ba   :  { %v678_v36 = vmul.f32 %v670_v32, %v2886_v55  ;;  %v2972_v55 = vld [vmem:[%s3393_s6 + $0x38] sm:$0xff] }
 0x3bb   :  { %712 = vperm.xlu1 %2383, %v670_v32   ;;  %717 = vperm.xlu0 %2384, %v671_v34   ;;  %v679_v38 = vmul.f32 %v671_v34, %v2888_v59 }
 0x3bc   :  { %v686_v39 = vsub.f32 %v2953_v35, %v678_v36 }
 0x3bd   :  { %v687_v41 = vsub.f32 %v2959_v37, %v679_v38 }
 0x3bf   :  { %v2414_v45 = vpop.eup %2413  ;;  %760 = vperm.xlu1 %2383, %v686_v39   ;;  %765 = vperm.xlu0 %2384, %v687_v41  }
 0x3c0   :  { %v2416_v47 = vpop.eup %2415  ;;  %v672_v59 = vmul.f32 %v2414_v45, %v2967_v10 }
 0x3c1   :  { %v673_v48 = vmul.f32 %v2416_v47, %v2972_v55 }
 0x3c2   :  { %v680_v30 = vmul.f32 %v672_v59, %v2909_v9 }
 0x3c3   :  { %727 = vperm.xlu0 %2384, %v673_v48   ;;  %722 = vperm.xlu1 %2383, %v672_v59   ;;  %v681_v50 = vmul.f32 %v673_v48, %v2911_v33 }
 0x3c4   :  { %v688_v14 = vsub.f32 %v2979_v49, %v680_v30 }
 0x3c5   :  { %v689_v51 = vsub.f32 %v2984_v12, %v681_v50 }
 0x3c7   :  { %775 = vperm.xlu0 %2384, %v689_v51   ;;  %770 = vperm.xlu1 %2383, %v688_v14  }
 0x3cb   :  { %796 = vperm.xlu1 %2383, %v93_v52  }
 0x429   :  { %v693_v9 = vpop.permute.xlu0 %692 }
 0x42a   :  { %v698_v54 = vpop.permute.xlu1 %697  ;;  %v730_v33 = vmul.f32 %v693_v9, %v2841_v3 }
 0x42b   :  { %v731_v56 = vmul.f32 %v2838_v2, %v698_v54 }
 0x42e   :  { %v741_v15 = vpop.permute.xlu1 %740  ;;  %v746_v17 = vpop.permute.xlu0 %745 }
 0x42f   :  { %v778_v6 = vadd.f32 %v741_v15, %v730_v33  ;;  %v779_v7 = vadd.f32 %v746_v17, %v731_v56 }
 0x431   :  { %v786_v19 = vmax.f32 %v778_v6, 0.0  ;;  %v787_v21 = vmax.f32 %v779_v7, 0.0 }
 0x432   :  { %v703_v24 = vpop.permute.xlu1 %702  ;;  %v708_v25 = vpop.permute.xlu0 %707 }
 0x433   :  { %v2334_v27 = vpack.c.bf16 %v787_v21, %v786_v19  ;;  %v732_v46 = vmul.f32 %v703_v24, %v2850_v11  ;;  %v733_v29 = vmul.f32 %v2848_v57, %v708_v25  ;;  %v3009_v19 = vld [vmem:[%s3395_s8] sm:$0xff] }
 0x435   :  { %2335 = vmatpush3.bf16.msra.mxu0 %v2334_v27 }
 0x436   :  { %v751_v32 = vpop.permute.xlu1 %750  ;;  %v756_v34 = vpop.permute.xlu0 %755  ;;  %2336 = vmatprep.subr.bf16.mxu0 %v3405_v26 }
 0x437   :  { %v780_v3 = vadd.f32 %v751_v32, %v732_v46  ;;  %v781_v2 = vadd.f32 %v756_v34, %v733_v29 }
 0x439   :  { %v788_v36 = vmax.f32 %v780_v3, 0.0  ;;  %v789_v38 = vmax.f32 %v781_v2, 0.0 }
 0x43a   :  { %v713_v39 = vpop.permute.xlu1 %712  ;;  %v718_v41 = vpop.permute.xlu0 %717 }
 0x43b   :  { %v2337_v45 = vpack.c.bf16 %v789_v38, %v788_v36  ;;  %v734_v47 = vmul.f32 %v713_v39, %v2855_v16  ;;  %v735_v59 = vmul.f32 %v2852_v13, %v718_v41 }
 0x43d   :  { %2338 = vmatpush3.bf16.msra.mxu0 %v2337_v45 }
 0x43e   :  { %v761_v11 = vpop.permute.xlu1 %760  ;;  %v766_v48 = vpop.permute.xlu0 %765  ;;  %2339 = vmatprep.subr.bf16.mxu0 %v3405_v26 }
 0x43f   :  { %v782_v57 = vadd.f32 %v761_v11, %v734_v47  ;;  %v783_v30 = vadd.f32 %v766_v48, %v735_v59 }
 0x441   :  { %v790_v50 = vmax.f32 %v782_v57, 0.0  ;;  %v791_v14 = vmax.f32 %v783_v30, 0.0 }
 0x442   :  { %v723_v51 = vpop.permute.xlu1 %722  ;;  %v728_v52 = vpop.permute.xlu0 %727 }
 0x443   :  { %v2340_v9 = vpack.c.bf16 %v791_v14, %v790_v50  ;;  %v736_v54 = vmul.f32 %v723_v51, %v2864_v23  ;;  %v737_v33 = vmul.f32 %v2862_v22, %v728_v52  ;;  %v938_v22 = vld [vmem:[%s3389_s2] sm:$0xff] }
 0x445   :  { %2341 = vmatpush3.bf16.msra.mxu0 %v2340_v9 }
 0x446   :  { %v771_v16 = vpop.permute.xlu1 %770  ;;  %v776_v56 = vpop.permute.xlu0 %775  ;;  %2342 = vmatprep.subr.bf16.mxu0 %v3405_v26 }
 0x447   :  { %v784_v13 = vadd.f32 %v771_v16, %v736_v54  ;;  %v785_v15 = vadd.f32 %v776_v56, %v737_v33 }
 0x449   :  { %v792_v17 = vmax.f32 %v784_v13, 0.0  ;;  %v793_v6 = vmax.f32 %v785_v15, 0.0 }
 0x44a   :  { %v3017_v23 = vpop.permute.xlu1 %796 }
 0x44b   :  { %v2343_v7 = vpack.c.bf16 %v793_v6, %v792_v17 }
 0x44d   :  { %2344 = vmatpush3.bf16.msra.mxu0 %v2343_v7 }
 0x450   :  { %2234 = vmatmul.mubr.msk.f32.vlgmr.msra.gmra.mrb[8].mxu0 %vm448_vm1, %v3009_v19 }
 0x451   :  { %2238 = vmatprep.mubr.msk.f32.mxu0 %vm102_vm0, %v938_v22 }
 0x523   :  { %v868_v21 = vpop.f32.mrb[8].mxu0 }
 0x524   :  { %v3020_v24 = vadd.f32 %v868_v21, %v3017_v23  ;;  %v2235_v25 = vpop.f32.mrb[9].mxu0 }
 0x526   :  { %3409 = vst [vmem:[#allocation5_spill] sm:$0xff] %v3020_v24  ;;  %v872_v27 = vmul.f32 10.0, %v3020_v24  ;;  %v2072_v41 = vmul.f32 -1.442695, %v3020_v24 }
 0x528   :  { %v873_v46 = vand.u32 2147483647, %v872_v27  ;;  %vm897_vm5 = vcmp.lt.f32.partialorder %v872_v27, 0.0  ;;  %v3034_v27 = vld [vmem:[%s3387_s0] sm:$0xff] }
 0x52a   :  { %v879_v29 = vadd.f32 1.0, %v873_v46  ;;  %2417 = vrcp.f32 %v873_v46  ;;  %v2069_v34 = vadd.f32 -1.0, %v873_v46  ;;  %vm875_vm3 = vcmp.gt.f32.partialorder %v873_v46, 0.41421357 }
 0x52b   :  { %vm874_vm4 = vcmp.gt.f32.partialorder %v873_v46, 2.4142137  ;;  %v884_v30 = vsel %vm875_vm3, 0.7853982, %v3403_v53 }
 0x52c   :  { %2419 = vrcp.f32 %v879_v29  ;;  %v885_v9 = vsel %vm874_vm4, 1.5707964, %v884_v30  ;;  %v944_v30 = vld [vmem:[%s3389_s2 + $0x30] sm:$0xff] }
 0x52d   :  { %2421 = vpow2.f32 %v2072_v41 }
 0x534   :  { %v2418_v32 = vpop.eup %2417 }
 0x535   :  { %v877_v36 = vmul.f32 -1.0, %v2418_v32 }
 0x536   :  { %v2420_v3 = vpop.eup %2419 }
 0x537   :  { %v881_v2 = vmul.f32 %v2420_v3, %v2069_v34  ;;  %v2422_v51 = vpop.eup %2421 }
 0x538   :  { %v905_v33 = vadd.f32 1.0, %v2422_v51 }
 0x539   :  { %v882_v38 = vsel %vm875_vm3, %v881_v2, %v873_v46 }
 0x53a   :  { %v883_v39 = vsel %vm874_vm4, %v877_v36, %v882_v38  ;;  %2423 = vrcp.f32 %v905_v33  ;;  %v934_v36 = vrot.slane %v3034_v27, 7 }
 0x53b   :  { %v886_v45 = vmul.f32 %v883_v39, %v883_v39 }
 0x53d   :  { %v887_v47 = vmul.f32 0.080537446, %v886_v45  ;;  %v893_v14 = vmul.f32 %v886_v45, %v883_v39 }
 0x53f   :  { %v2070_v59 = vadd.f32 -0.13877685, %v887_v47  ;;  %v939_v47 = vld [vmem:[%s3389_s2 + $0x8] sm:$0xff] }
 0x541   :  { %v889_v11 = vmul.f32 %v2070_v59, %v886_v45  ;;  %v940_v59 = vld [vmem:[%s3389_s2 + $0x10] sm:$0xff] }
 0x543   :  { %v890_v48 = vadd.f32 0.19977711, %v889_v11  ;;  %v941_v11 = vld [vmem:[%s3389_s2 + $0x18] sm:$0xff] }
 0x544   :  { %v2424_v21 = vpop.eup %2423 }
 0x545   :  { %v891_v57 = vmul.f32 %v890_v48, %v886_v45  ;;  %v942_v48 = vld [vmem:[%s3389_s2 + $0x20] sm:$0xff] }
 0x547   :  { %v2071_v50 = vadd.f32 -0.3333295, %v891_v57  ;;  %v943_v57 = vld [vmem:[%s3389_s2 + $0x28] sm:$0xff] }
 0x549   :  { %v894_v52 = vmul.f32 %v2071_v50, %v893_v14  ;;  %v945_v50 = vld [vmem:[%s3389_s2 + $0x38] sm:$0xff] }
 0x54b   :  { %v895_v54 = vadd.f32 %v894_v52, %v885_v9 }
 0x54d   :  { %v896_v16 = vadd.f32 %v895_v54, %v883_v39 }
 0x54f   :  { %v898_v56 = vsub.f32 0.0, %v896_v16 }
 0x551   :  { %v899_v13 = vsel %vm897_vm5, %v898_v56, %v896_v16 }
 0x552   :  { %v900_v15 = vmul.f32 0.31830987, %v899_v13 }
 0x554   :  { %v901_v17 = vadd.f32 0.5, %v900_v15 }
 0x556   :  { %v912_v6 = vsub.f32 1.0, %v901_v17  ;;  %v909_v7 = vrot.slane %v901_v17, 6 }
 0x558   :  { %v914_v22 = vrot.slane %v912_v6, 4  ;;  %v911_v29 = vmul.f32 %v2424_v21, %v909_v7 }
 0x55a   :  { %v916_v25 = vmul.f32 %v2424_v21, %v914_v22 }
 0x55c   :  { %v918_v32 = vrot.slane %v916_v25, 2 }
 0x55e   :  { %v3027_v34 = vadd.f32 %v918_v32, %v911_v29 }
 0x560   :  { %v922_v46 = vrot.slane %v3027_v34, 2  ;;  %v925_v3 = vrot.slane %v3027_v34, 3 }
 0x562   :  { %v927_v2 = vadd.f32 %v3034_v27, %v925_v3  ;;  %v924_v38 = vsub.f32 %v3034_v27, %v922_v46 }
 0x564   :  { %v929_v39 = vrot.slane %v927_v2, 7 }
 0x566   :  { %v3040_v41 = vsel %vm931_vm6, %v924_v38, %v929_v39 }
 0x567   :  { %3410 = vst [vmem:[#allocation6_spill] sm:$0xff] %v3040_v41  ;;  %v937_v45 = vsel %vm936_vm7, %v3040_v41, %v934_v36 }
 0x568   :  { %2236 = vmatprep.subr.mxu0 %v937_v45 }
 0x569   :  { %2237 = vmatpush3.msra.mxu0 %v937_v45 }
 0x56a   :  { %2239 = vmatmul.mubr.msk.f32.vlgmr.msra.gmra.mrb[10].mxu0 %vm102_vm0, %v939_v47  ;;  %2361 = vmatprep.subr.bf16.mxu0 %v3405_v26 }
 0x56b   :  { %2241 = vmatprep.mubr.msk.f32.mxu0 %vm102_vm0, %v940_v59 }
 0x56e   :  { %2242 = vmatmul.mubr.msk.f32.gmra.mrb[12].mxu0 %vm102_vm0, %v941_v11 }
 0x56f   :  { %2244 = vmatprep.mubr.msk.f32.mxu0 %vm102_vm0, %v942_v48 }
 0x572   :  { %2245 = vmatmul.mubr.msk.f32.gmra.mrb[14].mxu0 %vm102_vm0, %v943_v57 }
 0x573   :  { %2247 = vmatprep.mubr.msk.f32.mxu0 %vm102_vm0, %v944_v30 }
 0x576   :  { %2248 = vmatmul.mubr.msk.f32.gmra.mrb[16].mxu0 %vm102_vm0, %v945_v50 }
 0x577   :  { %2294 = vmatprep.mubr.msk.f32.mxu0 %vm2521_vm2, %v3403_v53 }
 0x63d   :  { %v3075_v14 = vpop.f32.mrb[10].mxu0 }
 0x63e   :  { %1077 = vadd.xlane.f32.xlu1 %v3075_v14  ;;  %v3078_v51 = vpop.f32.mrb[11].mxu0  ;;  %v1100_v9 = vmul.f32 %v3075_v14, %v3075_v14 }
 0x63f   :  { %1075 = vadd.xlane.f32.xlu0 %v3078_v51  ;;  %v1099_v16 = vmul.f32 %v3078_v51, %v3078_v51 }
 0x641   :  { %v3081_v52 = vpop.f32.mrb[12].mxu0 }
 0x642   :  { %v3085_v54 = vpop.f32.mrb[13].mxu0  ;;  %v1102_v7 = vmul.f32 %v3081_v52, %v3081_v52 }
 0x643   :  { %1109 = vadd.xlane.f32.xlu0 %v1100_v9  ;;  %1079 = vadd.xlane.f32.xlu1 %v3085_v54  ;;  %v1101_v33 = vmul.f32 %v3085_v54, %v3085_v54 }
 0x645   :  { %v3092_v56 = vpop.f32.mrb[14].mxu0 }
 0x646   :  { %v3094_v13 = vpop.f32.mrb[15].mxu0  ;;  %v1104_v22 = vmul.f32 %v3092_v56, %v3092_v56 }
 0x647   :  { %1107 = vadd.xlane.f32.xlu0 %v1099_v16  ;;  %1111 = vadd.xlane.f32.xlu1 %v1101_v33  ;;  %v1103_v6 = vmul.f32 %v3094_v13, %v3094_v13 }
 0x649   :  { %v3096_v15 = vpop.f32.mrb[16].mxu0 }
 0x64a   :  { %v3098_v17 = vpop.f32.mrb[17].mxu0  ;;  %v1106_v25 = vmul.f32 %v3096_v15, %v3096_v15 }
 0x64b   :  { %1081 = vadd.xlane.f32.xlu0 %v3081_v52  ;;  %1083 = vadd.xlane.f32.xlu1 %v3094_v13  ;;  %v1105_v21 = vmul.f32 %v3098_v17, %v3098_v17 }
 0x64f   :  { %1113 = vadd.xlane.f32.xlu0 %v1102_v7  ;;  %1115 = vadd.xlane.f32.xlu1 %v1103_v6 }
 0x653   :  { %1085 = vadd.xlane.f32.xlu0 %v3092_v56  ;;  %1087 = vadd.xlane.f32.xlu1 %v3098_v17 }
 0x657   :  { %1117 = vadd.xlane.f32.xlu0 %v1104_v22  ;;  %1119 = vadd.xlane.f32.xlu1 %v1105_v21 }
 0x65b   :  { %1089 = vadd.xlane.f32.xlu0 %v3096_v15 }
 0x65f   :  { %1121 = vadd.xlane.f32.xlu0 %v1106_v25 }
 0x6cb   :  { %v1078_v29 = vpop.xlane.xlu1 %1077 }
 0x6cc   :  { %v1076_v32 = vpop.xlane.xlu0 %1075  ;;  %v1092_v46 = vmul.f32 0.0078125, %v1078_v29 }
 0x6cd   :  { %v3115_v38 = vmul.f32 0.0078125, %v1076_v32 }
 0x6ce   :  { %v1132_v36 = vmul.f32 %v1092_v46, %v1092_v46 }
 0x6cf   :  { %v1131_v57 = vmul.f32 %v3115_v38, %v3115_v38 }
 0x6d0   :  { %v1110_v3 = vpop.xlane.xlu0 %1109  ;;  %v1080_v2 = vpop.xlane.xlu1 %1079 }
 0x6d1   :  { %v1124_v39 = vmul.f32 0.0078125, %v1110_v3  ;;  %v1093_v45 = vmul.f32 0.0078125, %v1080_v2 }
 0x6d3   :  { %v1140_v47 = vsub.f32 %v1124_v39, %v1132_v36  ;;  %v1133_v59 = vmul.f32 %v1093_v45, %v1093_v45 }
 0x6d4   :  { %v1108_v11 = vpop.xlane.xlu0 %1107  ;;  %v1112_v48 = vpop.xlane.xlu1 %1111 }
 0x6d5   :  { %v1148_v30 = vadd.f32 1e-05, %v1140_v47  ;;  %v1123_v50 = vmul.f32 0.0078125, %v1108_v11  ;;  %v1125_v9 = vmul.f32 0.0078125, %v1112_v48 }
 0x6d7   :  { %2425 = vrsqrt.f32 %v1148_v30  ;;  %v1139_v33 = vsub.f32 %v1123_v50, %v1131_v57  ;;  %v1141_v16 = vsub.f32 %v1125_v9, %v1133_v59 }
 0x6d8   :  { %v1082_v6 = vpop.xlane.xlu0 %1081  ;;  %v1084_v7 = vpop.xlane.xlu1 %1083 }
 0x6d9   :  { %v1147_v22 = vadd.f32 1e-05, %v1139_v33  ;;  %v1149_v21 = vadd.f32 1e-05, %v1141_v16  ;;  %v3119_v25 = vmul.f32 0.0078125, %v1082_v6  ;;  %v3121_v29 = vmul.f32 0.0078125, %v1084_v7 }
 0x6da   :  { %v2480_v6 = vld [vmem:[%s3390_s3 + $0x8] sm:$0xff] }
 0x6db   :  { %2427 = vrsqrt.f32 %v1147_v22  ;;  %v1135_v32 = vmul.f32 %v3121_v29, %v3121_v29  ;;  %v1134_v36 = vmul.f32 %v3119_v25, %v3119_v25 }
 0x6dc   :  { %2429 = vrsqrt.f32 %v1149_v21  ;;  %v1114_v3 = vpop.xlane.xlu0 %1113  ;;  %v1116_v2 = vpop.xlane.xlu1 %1115 }
 0x6dd   :  { %v1126_v39 = vmul.f32 0.0078125, %v1114_v3  ;;  %v1127_v47 = vmul.f32 0.0078125, %v1116_v2 }
 0x6df   :  { %v1142_v59 = vsub.f32 %v1126_v39, %v1134_v36  ;;  %v1143_v11 = vsub.f32 %v1127_v47, %v1135_v32 }
 0x6e0   :  { %v1086_v48 = vpop.xlane.xlu0 %1085  ;;  %v1088_v57 = vpop.xlane.xlu1 %1087 }
 0x6e1   :  { %v2426_v30 = vpop.eup %2425  ;;  %v1150_v50 = vadd.f32 1e-05, %v1142_v59  ;;  %v1151_v9 = vadd.f32 1e-05, %v1143_v11  ;;  %v3127_v33 = vmul.f32 0.0078125, %v1086_v48  ;;  %v3129_v16 = vmul.f32 0.0078125, %v1088_v57 }
 0x6e2   :  { %v1164_v7 = vmul.f32 %v2480_v6, %v2426_v30  ;;  %v2481_v59 = vld [vmem:[%s3390_s3] sm:$0xff] }
 0x6e3   :  { %2431 = vrsqrt.f32 %v1150_v50  ;;  %v1136_v22 = vmul.f32 %v3127_v33, %v3127_v33  ;;  %v1137_v21 = vmul.f32 %v3129_v16, %v3129_v16 }
 0x6e4   :  { %2433 = vrsqrt.f32 %v1151_v9  ;;  %v1118_v32 = vpop.xlane.xlu0 %1117  ;;  %1194 = vperm.xlu0 %2384, %v1164_v7   ;;  %v1120_v3 = vpop.xlane.xlu1 %1119  ;;  %v1172_v48 = vmul.f32 %v1164_v7, %v1092_v46 }
 0x6e5   :  { %v2428_v2 = vpop.eup %2427  ;;  %v1128_v36 = vmul.f32 0.0078125, %v1118_v32  ;;  %v1129_v39 = vmul.f32 0.0078125, %v1120_v3  ;;  %v2482_v32 = vld [vmem:[%s3391_s4 + $0x8] sm:$0xff] }
 0x6e6   :  { %v2430_v47 = vpop.eup %2429  ;;  %v1163_v11 = vmul.f32 %v2481_v59, %v2428_v2  ;;  %v1180_v3 = vsub.f32 %v2482_v32, %v1172_v48  ;;  %v2487_v32 = vld [vmem:[%s3391_s4 + $0x28] sm:$0xff] }
 0x6e7   :  { %v1144_v57 = vsub.f32 %v1128_v36, %v1136_v22  ;;  %v1145_v30 = vsub.f32 %v1129_v39, %v1137_v21  ;;  %v1165_v50 = vmul.f32 %v2430_v47, %v2720_v44 }
 0x6e8   :  { %v1090_v6 = vpop.xlane.xlu0 %1089  ;;  %1189 = vperm.xlu1 %2383, %v1163_v11   ;;  %v1171_v36 = vmul.f32 %v1163_v11, %v3115_v38 }
 0x6e9   :  { %v1152_v9 = vadd.f32 1e-05, %v1144_v57  ;;  %v1153_v53 = vadd.f32 1e-05, %v1145_v30  ;;  %v1098_v26 = vmul.f32 0.0078125, %v1090_v6  ;;  %1199 = vperm.xlu0 %2384, %v1165_v50   ;;  %v1173_v24 = vmul.f32 %v1165_v50, %v1093_v45  ;;  %v2483_v45 = vld [vmem:[%s3390_s3 + $0x18] sm:$0xff] }
 0x6eb   :  { %2435 = vrsqrt.f32 %v1152_v9  ;;  %v1138_v41 = vmul.f32 %v1098_v26, %v1098_v26  ;;  %v1181_v46 = vsub.f32 %v2737_v43, %v1173_v24 }
 0x6ec   :  { %2437 = vrsqrt.f32 %v1153_v53  ;;  %v1122_v7 = vpop.xlane.xlu0 %1121  ;;  %1242 = vperm.xlu1 %2383, %v1180_v3   ;;  %v2484_v53 = vld [vmem:[%s3391_s4] sm:$0xff] }
 0x6ed   :  { %v2432_v44 = vpop.eup %2431  ;;  %1247 = vperm.xlu0 %2384, %v1181_v46   ;;  %v1130_v22 = vmul.f32 0.0078125, %v1122_v7  ;;  %v1179_v24 = vsub.f32 %v2484_v53, %v1171_v36 }
 0x6ee   :  { %v2434_v21 = vpop.eup %2433  ;;  %v1166_v2 = vmul.f32 %v2483_v45, %v2432_v44 }
 0x6ef   :  { %v1146_v39 = vsub.f32 %v1130_v22, %v1138_v41  ;;  %v1167_v47 = vmul.f32 %v2434_v21, %v2745_v60  ;;  %v2485_v60 = vld [vmem:[%s3391_s4 + $0x18] sm:$0xff] }
 0x6f0   :  { %1204 = vperm.xlu1 %2383, %v1166_v2   ;;  %v1174_v48 = vmul.f32 %v1166_v2, %v3119_v25 }
 0x6f1   :  { %v1154_v59 = vadd.f32 1e-05, %v1146_v39  ;;  %1209 = vperm.xlu0 %2384, %v1167_v47   ;;  %v1175_v43 = vmul.f32 %v1167_v47, %v3121_v29  ;;  %v2486_v29 = vld [vmem:[%s3390_s3 + $0x28] sm:$0xff] }
 0x6f2   :  { %v1182_v11 = vsub.f32 %v2485_v60, %v1174_v48 }
 0x6f3   :  { %2439 = vrsqrt.f32 %v1154_v59  ;;  %v1183_v57 = vsub.f32 %v2756_v4, %v1175_v43 }
 0x6f4   :  { %1237 = vperm.xlu1 %2383, %v1179_v24  }
 0x6f5   :  { %v2436_v38 = vpop.eup %2435  ;;  %1257 = vperm.xlu0 %2384, %v1183_v57  }
 0x6f6   :  { %v2438_v41 = vpop.eup %2437  ;;  %v1168_v30 = vmul.f32 %v2486_v29, %v2436_v38 }
 0x6f7   :  { %v1169_v50 = vmul.f32 %v2438_v41, %v2761_v5  ;;  %v2488_v5 = vld [vmem:[%s3390_s3 + $0x38] sm:$0xff] }
 0x6f8   :  { %1252 = vperm.xlu1 %2383, %v1182_v11   ;;  %v1176_v25 = vmul.f32 %v1168_v30, %v3127_v33 }
 0x6f9   :  { %1219 = vperm.xlu0 %2384, %v1169_v50   ;;  %v1177_v4 = vmul.f32 %v1169_v50, %v3129_v16 }
 0x6fa   :  { %v1184_v3 = vsub.f32 %v2487_v32, %v1176_v25 }
 0x6fb   :  { %v1185_v6 = vsub.f32 %v2769_v8, %v1177_v4  ;;  %v2489_v8 = vld [vmem:[%s3391_s4 + $0x38] sm:$0xff] }
 0x6fc   :  { %1214 = vperm.xlu1 %2383, %v1168_v30  }
 0x6fd   :  { %v2440_v9 = vpop.eup %2439  ;;  %1267 = vperm.xlu0 %2384, %v1185_v6  }
 0x6fe   :  { %v1170_v46 = vmul.f32 %v2488_v5, %v2440_v9 }
 0x700   :  { %1262 = vperm.xlu1 %2383, %v1184_v3   ;;  %v1178_v7 = vmul.f32 %v1170_v46, %v1098_v26 }
 0x702   :  { %v1186_v33 = vsub.f32 %v2489_v8, %v1178_v7 }
 0x704   :  { %1224 = vperm.xlu1 %2383, %v1170_v46  }
 0x708   :  { %1272 = vperm.xlu1 %2383, %v1186_v33  }
 0x763   :  { %v1195_v16 = vpop.permute.xlu0 %1194 }
 0x764   :  { %v1228_v36 = vmul.f32 %v3075_v14, %v1195_v16 }
 0x767   :  { %v1190_v44 = vpop.permute.xlu1 %1189 }
 0x768   :  { %v1200_v22 = vpop.permute.xlu0 %1199  ;;  %v1227_v47 = vmul.f32 %v1190_v44, %v3078_v51 }
 0x769   :  { %v1229_v43 = vmul.f32 %v1200_v22, %v3085_v54 }
 0x76b   :  { %v1243_v21 = vpop.permute.xlu1 %1242 }
 0x76c   :  { %v1248_v45 = vpop.permute.xlu0 %1247  ;;  %v1276_v59 = vadd.f32 %v1243_v21, %v1228_v36 }
 0x76d   :  { %v1277_v24 = vadd.f32 %v1248_v45, %v1229_v43  ;;  %v3411_v45 = vmov 0.0|0.0  }
 0x76e   :  { %v1284_v48 = vmax.f32 %v1276_v59, 0.0 }
 0x76f   :  { %v1205_v2 = vpop.permute.xlu1 %1204  ;;  %v1285_v30 = vmax.f32 %v1277_v24, 0.0 }
 0x770   :  { %v1210_v39 = vpop.permute.xlu0 %1209  ;;  %v1230_v57 = vmul.f32 %v3081_v52, %v1205_v2 }
 0x771   :  { %v1231_v51 = vmul.f32 %v1210_v39, %v3094_v13 }
 0x773   :  { %v1238_v26 = vpop.permute.xlu1 %1237 }
 0x774   :  { %v1275_v53 = vadd.f32 %v1238_v26, %v1227_v47  ;;  %v1258_v41 = vpop.permute.xlu0 %1257 }
 0x775   :  { %v1279_v54 = vadd.f32 %v1258_v41, %v1231_v51 }
 0x776   :  { %v1283_v38 = vmax.f32 %v1275_v53, 0.0 }
 0x777   :  { %v1253_v60 = vpop.permute.xlu1 %1252  ;;  %v1287_v32 = vmax.f32 %v1279_v54, 0.0 }
 0x778   :  { %v2345_v11 = vpack.c.bf16 %v1284_v48, %v1283_v38  ;;  %v1278_v29 = vadd.f32 %v1253_v60, %v1230_v57  ;;  %v1220_v25 = vpop.permute.xlu0 %1219 }
 0x779   :  { %v1233_v7 = vmul.f32 %v1220_v25, %v3098_v17 }
 0x77a   :  { %v1286_v50 = vmax.f32 %v1278_v29, 0.0  ;;  %2346 = vmatprep.subr.bf16.mxu1 %v2345_v11 }
 0x77b   :  { %2348 = vmatpush3.bf16.msra.mxu1 %v2345_v11  ;;  %v1215_v14 = vpop.permute.xlu1 %1214 }
 0x77c   :  { %v2349_v4 = vpack.c.bf16 %v1286_v50, %v1285_v30  ;;  %v1232_v6 = vmul.f32 %v3092_v56, %v1215_v14  ;;  %v1268_v5 = vpop.permute.xlu0 %1267 }
 0x77d   :  { %v1281_v33 = vadd.f32 %v1268_v5, %v1233_v7 }
 0x77e   :  { %2350 = vmatprep.subr.bf16.mxu1 %v2349_v4 }
 0x77f   :  { %2352 = vmatpush3.bf16.msra.mxu1 %v2349_v4  ;;  %v1263_v52 = vpop.permute.xlu1 %1262  ;;  %v1289_v22 = vmax.f32 %v1281_v33, 0.0 }
 0x780   :  { %v1280_v9 = vadd.f32 %v1263_v52, %v1232_v6 }
 0x782   :  { %v1288_v3 = vmax.f32 %v1280_v9, 0.0 }
 0x783   :  { %v1225_v46 = vpop.permute.xlu1 %1224 }
 0x784   :  { %v2353_v8 = vpack.c.bf16 %v1288_v3, %v1287_v32  ;;  %v1234_v16 = vmul.f32 %v3096_v15, %v1225_v46  ;;  %v3412_v15 = vmov 0.0  }
 0x786   :  { %2354 = vmatprep.subr.bf16.mxu1 %v2353_v8 }
 0x787   :  { %2356 = vmatpush3.bf16.msra.mxu1 %v2353_v8  ;;  %v1273_v13 = vpop.permute.xlu1 %1272 }
 0x788   :  { %v1282_v44 = vadd.f32 %v1273_v13, %v1234_v16 }
 0x78a   :  { %v1290_v56 = vmax.f32 %v1282_v44, 0.0 }
 0x78c   :  { %v2357_v21 = vpack.c.bf16 %v1290_v56, %v1289_v22 }
 0x78e   :  { %2358 = vmatprep.subr.bf16.mxu1 %v2357_v21 }
 0x78f   :  { %2360 = vmatpush3.bf16.msra.mxu1 %v2357_v21 }
 0x790   :  { %2373 = vmatprep.subr.bf16.mxu1 %v3411_v45 }
 0x792   :  { %2267 = vmatmul.mubr.msk.f32.vlgmr.msra.gmra.mrb[8].mxu1 %vm448_vm1, %v2790_v61 }
 0x793   :  { %2269 = vmatprep.mubr.msk.f32.mxu1 %vm448_vm1, %v2795_v18 }
 0x796   :  { %2270 = vmatmul.mubr.msk.f32.gmra.mrb[10].mxu1 %vm448_vm1, %v2804_v20 }
 0x797   :  { %2272 = vmatprep.mubr.msk.f32.mxu1 %vm448_vm1, %v2809_v62 }
 0x79a   :  { %2273 = vmatmul.mubr.msk.f32.gmra.mrb[12].mxu1 %vm448_vm1, %v2818_v63 }
 0x79b   :  { %2275 = vmatprep.mubr.msk.f32.mxu1 %vm448_vm1, %v2823_v0 }
 0x79e   :  { %2276 = vmatmul.mubr.msk.f32.gmra.mrb[14].mxu1 %vm448_vm1, %v2832_v1 }
 0x79f   :  { %2314 = vmatprep.mubr.msk.f32.mxu1 %vm2521_vm2, %v3412_v15 }
 0x865   :  { %v3201_v61 = vpop.f32.mrb[8].mxu1 }
 0x866   :  { %1398 = vadd.xlane.f32.xlu1 %v3201_v61  ;;  %v3204_v18 = vpop.f32.mrb[9].mxu1  ;;  %v1421_v62 = vmul.f32 %v3201_v61, %v3201_v61 }
 0x867   :  { %1396 = vadd.xlane.f32.xlu0 %v3204_v18  ;;  %v1420_v1 = vmul.f32 %v3204_v18, %v3204_v18 }
 0x869   :  { %v3207_v20 = vpop.f32.mrb[10].mxu1 }
 0x86a   :  { %v3211_v63 = vpop.f32.mrb[11].mxu1  ;;  %v1423_v59 = vmul.f32 %v3207_v20, %v3207_v20 }
 0x86b   :  { %v1422_v0 = vmul.f32 %v3211_v63, %v3211_v63  ;;  %1430 = vadd.xlane.f32.xlu0 %v1421_v62  ;;  %1400 = vadd.xlane.f32.xlu1 %v3211_v63 }
 0x86d   :  { %v3218_v17 = vpop.f32.mrb[12].mxu1 }
 0x86e   :  { %v3220_v2 = vpop.f32.mrb[13].mxu1  ;;  %v1425_v26 = vmul.f32 %v3218_v17, %v3218_v17 }
 0x86f   :  { %1428 = vadd.xlane.f32.xlu0 %v1420_v1  ;;  %1432 = vadd.xlane.f32.xlu1 %v1422_v0  ;;  %v1424_v47 = vmul.f32 %v3220_v2, %v3220_v2 }
 0x871   :  { %v3222_v36 = vpop.f32.mrb[14].mxu1 }
 0x872   :  { %v3224_v39 = vpop.f32.mrb[15].mxu1  ;;  %v1427_v53 = vmul.f32 %v3222_v36, %v3222_v36 }
 0x873   :  { %1402 = vadd.xlane.f32.xlu0 %v3207_v20  ;;  %1404 = vadd.xlane.f32.xlu1 %v3220_v2  ;;  %v1426_v43 = vmul.f32 %v3224_v39, %v3224_v39 }
 0x877   :  { %1434 = vadd.xlane.f32.xlu0 %v1423_v59  ;;  %1436 = vadd.xlane.f32.xlu1 %v1424_v47 }
 0x87b   :  { %1406 = vadd.xlane.f32.xlu0 %v3218_v17  ;;  %1408 = vadd.xlane.f32.xlu1 %v3224_v39 }
 0x87f   :  { %1438 = vadd.xlane.f32.xlu0 %v1425_v26  ;;  %1440 = vadd.xlane.f32.xlu1 %v1426_v43 }
 0x883   :  { %1410 = vadd.xlane.f32.xlu0 %v3222_v36 }
 0x887   :  { %1442 = vadd.xlane.f32.xlu0 %v1427_v53 }
 0x8f3   :  { %v1399_v24 = vpop.xlane.xlu1 %1398 }
 0x8f4   :  { %v1397_v48 = vpop.xlane.xlu0 %1396  ;;  %v1413_v57 = vmul.f32 0.0078125, %v1399_v24 }
 0x8f5   :  { %v3241_v11 = vmul.f32 0.0078125, %v1397_v48 }
 0x8f6   :  { %v1453_v60 = vmul.f32 %v1413_v57, %v1413_v57 }
 0x8f7   :  { %v1452_v25 = vmul.f32 %v3241_v11, %v3241_v11 }
 0x8f8   :  { %v1431_v38 = vpop.xlane.xlu0 %1430  ;;  %v1401_v41 = vpop.xlane.xlu1 %1400 }
 0x8f9   :  { %v1445_v29 = vmul.f32 0.0078125, %v1431_v38  ;;  %v1414_v30 = vmul.f32 0.0078125, %v1401_v41 }
 0x8fb   :  { %v1461_v50 = vsub.f32 %v1445_v29, %v1453_v60  ;;  %v1454_v14 = vmul.f32 %v1414_v30, %v1414_v30 }
 0x8fc   :  { %v1429_v51 = vpop.xlane.xlu0 %1428  ;;  %v1433_v4 = vpop.xlane.xlu1 %1432 }
 0x8fd   :  { %v1469_v54 = vadd.f32 1e-05, %v1461_v50  ;;  %v1444_v6 = vmul.f32 0.0078125, %v1429_v51  ;;  %v1446_v52 = vmul.f32 0.0078125, %v1433_v4 }
 0x8ff   :  { %2441 = vrsqrt.f32 %v1469_v54  ;;  %v1460_v9 = vsub.f32 %v1444_v6, %v1452_v25  ;;  %v1462_v32 = vsub.f32 %v1446_v52, %v1454_v14  ;;  %v2490_v25 = vld [vmem:[%s3393_s6] sm:$0xff] }
 0x900   :  { %v1403_v3 = vpop.xlane.xlu0 %1402  ;;  %v1405_v5 = vpop.xlane.xlu1 %1404 }
 0x901   :  { %v1468_v46 = vadd.f32 1e-05, %v1460_v9  ;;  %v1470_v7 = vadd.f32 1e-05, %v1462_v32  ;;  %v3245_v8 = vmul.f32 0.0078125, %v1403_v3  ;;  %v3247_v33 = vmul.f32 0.0078125, %v1405_v5 }
 0x903   :  { %2443 = vrsqrt.f32 %v1468_v46  ;;  %v1456_v16 = vmul.f32 %v3247_v33, %v3247_v33  ;;  %v1455_v22 = vmul.f32 %v3245_v8, %v3245_v8 }
 0x904   :  { %2445 = vrsqrt.f32 %v1470_v7  ;;  %v1435_v13 = vpop.xlane.xlu0 %1434  ;;  %v1437_v44 = vpop.xlane.xlu1 %1436 }
 0x905   :  { %v1447_v56 = vmul.f32 0.0078125, %v1435_v13  ;;  %v1448_v21 = vmul.f32 0.0078125, %v1437_v44 }
 0x907   :  { %v1463_v62 = vsub.f32 %v1447_v56, %v1455_v22  ;;  %v1464_v0 = vsub.f32 %v1448_v21, %v1456_v16  ;;  %v2491_v16 = vld [vmem:[%s3394_s7 + $0x8] sm:$0xff] }
 0x908   :  { %v1407_v1 = vpop.xlane.xlu0 %1406  ;;  %v1409_v47 = vpop.xlane.xlu1 %1408 }
 0x909   :  { %v2442_v59 = vpop.eup %2441  ;;  %v1471_v26 = vadd.f32 1e-05, %v1463_v62  ;;  %v1472_v43 = vadd.f32 1e-05, %v1464_v0  ;;  %v3253_v53 = vmul.f32 0.0078125, %v1407_v1  ;;  %v1418_v24 = vmul.f32 0.0078125, %v1409_v47 }
 0x90a   :  { %v1485_v48 = vmul.f32 %v2442_v59, %v2896_v40 }
 0x90b   :  { %2447 = vrsqrt.f32 %v1471_v26  ;;  %v1457_v38 = vmul.f32 %v3253_v53, %v3253_v53  ;;  %v1458_v41 = vmul.f32 %v1418_v24, %v1418_v24  ;;  %v2493_v26 = vld [vmem:[%s3394_s7] sm:$0xff] }
 0x90c   :  { %2449 = vrsqrt.f32 %v1472_v43  ;;  %v1439_v60 = vpop.xlane.xlu0 %1438  ;;  %1515 = vperm.xlu0 %2384, %v1485_v48   ;;  %v1441_v29 = vpop.xlane.xlu1 %1440  ;;  %v1493_v6 = vmul.f32 %v1485_v48, %v1413_v57 }
 0x90d   :  { %v2444_v50 = vpop.eup %2443  ;;  %v1449_v14 = vmul.f32 0.0078125, %v1439_v60  ;;  %v1450_v51 = vmul.f32 0.0078125, %v1441_v29 }
 0x90e   :  { %v2446_v4 = vpop.eup %2445  ;;  %v1484_v54 = vmul.f32 %v2490_v25, %v2444_v50  ;;  %v1501_v13 = vsub.f32 %v2491_v16, %v1493_v6 }
 0x90f   :  { %v1465_v40 = vsub.f32 %v1449_v14, %v1457_v38  ;;  %v1466_v52 = vsub.f32 %v1450_v51, %v1458_v41  ;;  %v1486_v9 = vmul.f32 %v2446_v4, %v2916_v31 }
 0x910   :  { %v1411_v32 = vpop.xlane.xlu0 %1410  ;;  %1510 = vperm.xlu1 %2383, %v1484_v54   ;;  %v1492_v0 = vmul.f32 %v1484_v54, %v3241_v11 }
 0x911   :  { %v1473_v3 = vadd.f32 1e-05, %v1465_v40  ;;  %v1474_v5 = vadd.f32 1e-05, %v1466_v52  ;;  %v1419_v46 = vmul.f32 0.0078125, %v1411_v32  ;;  %1520 = vperm.xlu0 %2384, %v1486_v9   ;;  %v1494_v7 = vmul.f32 %v1486_v9, %v1414_v30  ;;  %v2492_v30 = vld [vmem:[%s3393_s6 + $0x18] sm:$0xff] }
 0x912   :  { %v1500_v43 = vsub.f32 %v2493_v26, %v1492_v0 }
 0x913   :  { %2451 = vrsqrt.f32 %v1473_v3  ;;  %v1459_v44 = vmul.f32 %v1419_v46, %v1419_v46  ;;  %v1502_v57 = vsub.f32 %v2929_v58, %v1494_v7 }
 0x914   :  { %2453 = vrsqrt.f32 %v1474_v5  ;;  %v1443_v22 = vpop.xlane.xlu0 %1442  ;;  %1563 = vperm.xlu1 %2383, %v1501_v13  }
 0x915   :  { %v2448_v31 = vpop.eup %2447  ;;  %1568 = vperm.xlu0 %2384, %v1502_v57   ;;  %v1451_v56 = vmul.f32 0.0078125, %v1443_v22 }
 0x916   :  { %v2450_v21 = vpop.eup %2449  ;;  %v1487_v62 = vmul.f32 %v2492_v30, %v2448_v31 }
 0x917   :  { %v1467_v1 = vsub.f32 %v1451_v56, %v1459_v44  ;;  %v1488_v47 = vmul.f32 %v2450_v21, %v2941_v42  ;;  %v2494_v42 = vld [vmem:[%s3394_s7 + $0x18] sm:$0xff] }
 0x918   :  { %1525 = vperm.xlu1 %2383, %v1487_v62   ;;  %v1495_v48 = vmul.f32 %v1487_v62, %v3245_v8 }
 0x919   :  { %v1475_v59 = vadd.f32 1e-05, %v1467_v1  ;;  %1530 = vperm.xlu0 %2384, %v1488_v47   ;;  %v1496_v58 = vmul.f32 %v1488_v47, %v3247_v33 }
 0x91a   :  { %v1503_v60 = vsub.f32 %v2494_v42, %v1495_v48 }
 0x91b   :  { %2455 = vrsqrt.f32 %v1475_v59  ;;  %v1504_v38 = vsub.f32 %v2953_v35, %v1496_v58 }
 0x91c   :  { %1558 = vperm.xlu1 %2383, %v1500_v43  }
 0x91d   :  { %v2452_v11 = vpop.eup %2451  ;;  %1578 = vperm.xlu0 %2384, %v1504_v38  }
 0x91e   :  { %v2454_v41 = vpop.eup %2453  ;;  %v1489_v33 = vmul.f32 %v2452_v11, %v2946_v28 }
 0x91f   :  { %v1490_v29 = vmul.f32 %v2454_v41, %v2967_v10 }
 0x920   :  { %1573 = vperm.xlu1 %2383, %v1503_v60   ;;  %v1497_v8 = vmul.f32 %v1489_v33, %v3253_v53 }
 0x921   :  { %1540 = vperm.xlu0 %2384, %v1490_v29   ;;  %v1498_v50 = vmul.f32 %v1490_v29, %v1418_v24 }
 0x922   :  { %v1505_v51 = vsub.f32 %v2959_v37, %v1497_v8 }
 0x923   :  { %v1506_v35 = vsub.f32 %v2979_v49, %v1498_v50 }
 0x924   :  { %1535 = vperm.xlu1 %2383, %v1489_v33  }
 0x925   :  { %v2456_v14 = vpop.eup %2455  ;;  %1588 = vperm.xlu0 %2384, %v1506_v35  }
 0x926   :  { %v1491_v4 = vmul.f32 %v2456_v14, %v2972_v55 }
 0x928   :  { %1583 = vperm.xlu1 %2383, %v1505_v51   ;;  %v1499_v25 = vmul.f32 %v1491_v4, %v1419_v46 }
 0x92a   :  { %v1507_v28 = vsub.f32 %v2984_v12, %v1499_v25 }
 0x92c   :  { %1545 = vperm.xlu1 %2383, %v1491_v4  }
 0x930   :  { %1593 = vperm.xlu1 %2383, %v1507_v28  }
 0x98b   :  { %v1516_v10 = vpop.permute.xlu0 %1515 }
 0x98c   :  { %v1549_v49 = vmul.f32 %v3201_v61, %v1516_v10 }
 0x98f   :  { %v1511_v54 = vpop.permute.xlu1 %1510 }
 0x990   :  { %v1521_v24 = vpop.permute.xlu0 %1520  ;;  %v1548_v9 = vmul.f32 %v1511_v54, %v3204_v18 }
 0x991   :  { %v1550_v55 = vmul.f32 %v1521_v24, %v3211_v63 }
 0x993   :  { %v1564_v6 = vpop.permute.xlu1 %1563 }
 0x994   :  { %v1569_v53 = vpop.permute.xlu0 %1568  ;;  %v1597_v37 = vadd.f32 %v1564_v6, %v1549_v49 }
 0x995   :  { %v1598_v5 = vadd.f32 %v1569_v53, %v1550_v55 }
 0x996   :  { %v1605_v46 = vmax.f32 %v1597_v37, 0.0 }
 0x997   :  { %v1526_v40 = vpop.permute.xlu1 %1525  ;;  %v1606_v22 = vmax.f32 %v1598_v5, 0.0 }
 0x998   :  { %v1531_v52 = vpop.permute.xlu0 %1530  ;;  %v1551_v12 = vmul.f32 %v3207_v20, %v1526_v40 }
 0x999   :  { %v1552_v18 = vmul.f32 %v1531_v52, %v3220_v2 }
 0x99b   :  { %v1559_v32 = vpop.permute.xlu1 %1558 }
 0x99c   :  { %v1596_v3 = vadd.f32 %v1559_v32, %v1548_v9  ;;  %v1579_v16 = vpop.permute.xlu0 %1578 }
 0x99d   :  { %v1600_v21 = vadd.f32 %v1579_v16, %v1552_v18 }
 0x99e   :  { %v1604_v7 = vmax.f32 %v1596_v3, 0.0 }
 0x99f   :  { %v1574_v13 = vpop.permute.xlu1 %1573  ;;  %v1608_v0 = vmax.f32 %v1600_v21, 0.0 }
 0x9a0   :  { %v2362_v44 = vpack.c.bf16 %v1605_v46, %v1604_v7  ;;  %v1599_v57 = vadd.f32 %v1574_v13, %v1551_v12  ;;  %v1541_v63 = vpop.permute.xlu0 %1540 }
 0x9a1   :  { %v1554_v58 = vmul.f32 %v1541_v63, %v3224_v39 }
 0x9a2   :  { %v1607_v31 = vmax.f32 %v1599_v57, 0.0  ;;  %2363 = vmatpush3.bf16.msra.mxu0 %v2362_v44 }
 0x9a3   :  { %v1536_v61 = vpop.permute.xlu1 %1535  ;;  %2364 = vmatprep.subr.bf16.mxu0 %v3411_v45 }
 0x9a4   :  { %v2365_v56 = vpack.c.bf16 %v1607_v31, %v1606_v22  ;;  %v1553_v30 = vmul.f32 %v3218_v17, %v1536_v61  ;;  %v1589_v47 = vpop.permute.xlu0 %1588 }
 0x9a5   :  { %v1602_v43 = vadd.f32 %v1589_v47, %v1554_v58 }
 0x9a6   :  { %2366 = vmatpush3.bf16.msra.mxu0 %v2365_v56 }
 0x9a7   :  { %v1584_v20 = vpop.permute.xlu1 %1583  ;;  %2367 = vmatprep.subr.bf16.mxu0 %v3411_v45  ;;  %v1610_v38 = vmax.f32 %v1602_v43, 0.0 }
 0x9a8   :  { %v1601_v62 = vadd.f32 %v1584_v20, %v1553_v30 }
 0x9aa   :  { %v1609_v1 = vmax.f32 %v1601_v62, 0.0 }
 0x9ab   :  { %v1546_v59 = vpop.permute.xlu1 %1545 }
 0x9ac   :  { %v2368_v26 = vpack.c.bf16 %v1609_v1, %v1608_v0  ;;  %v1555_v2 = vmul.f32 %v3222_v36, %v1546_v59  ;;  %v1754_v36 = vld [vmem:[%s3397_s10] sm:$0xff] }
 0x9ae   :  { %2369 = vmatpush3.bf16.msra.mxu0 %v2368_v26 }
 0x9af   :  { %v1594_v48 = vpop.permute.xlu1 %1593  ;;  %2370 = vmatprep.subr.bf16.mxu0 %v3411_v45  ;;  %v1755_v45 = vld [vmem:[%s3397_s10 + $0x8] sm:$0xff] }
 0x9b0   :  { %v1603_v17 = vadd.f32 %v1594_v48, %v1555_v2 }
 0x9b2   :  { %v1611_v11 = vmax.f32 %v1603_v17, 0.0 }
 0x9b4   :  { %v2371_v41 = vpack.c.bf16 %v1611_v11, %v1610_v38 }
 0x9b6   :  { %2372 = vmatpush3.bf16.msra.mxu0 %v2371_v41 }
 0x9b7   :  { %2297 = vmatprep.subr.mxu0 %v3412_v15 }
 0x9b9   :  { %2295 = vmatmul.mubr.msk.f32.vlgmr.msra.gmra.mrb[18].mxu0 %vm448_vm1, %v3009_v19  ;;  %v1756_v19 = vld [vmem:[%s3397_s10 + $0x10] sm:$0xff] }
 0x9ba   :  { %2298 = vmatpush3.msra.mxu0 %v3034_v27  ;;  %2299 = vmatprep.mubr.msk.f32.mxu0 %vm2521_vm2, %v3412_v15 }
 0x9bd   :  { %2300 = vmatmul.mubr.msk.f32.vlgmr.msra.gmra.mrb[20].mxu0 %vm102_vm0, %v1754_v36 }
 0x9be   :  { %2302 = vmatprep.mubr.msk.f32.mxu0 %vm2521_vm2, %v3412_v15 }
 0x9c1   :  { %2303 = vmatmul.mubr.msk.f32.gmra.mrb[22].mxu0 %vm102_vm0, %v1755_v45 }
 0x9c2   :  { %2305 = vmatprep.mubr.msk.f32.mxu0 %vm2521_vm2, %v3412_v15 }
 0x9c5   :  { %2306 = vmatmul.mubr.msk.f32.gmra.mrb[24].mxu0 %vm102_vm0, %v1756_v19 }
 0xa8c   :  { %v1678_v27 = vpop.f32.mrb[18].mxu0 }
 0xa8d   :  { %v1679_v39 = vadd.f32 %v1678_v27, %v3017_v23  ;;  %v2296_v42 = vpop.f32.mrb[19].mxu0 }
 0xa8f   :  { %v1682_v60 = vmul.f32 10.0, %v1679_v39  ;;  %v2093_v52 = vmul.f32 -1.442695, %v1679_v39 }
 0xa90   :  { %v3321_v33 = vpop.f32.mrb[20].mxu0 }
 0xa91   :  { %v1683_v29 = vand.u32 2147483647, %v1682_v60  ;;  %1852 = vadd.xlane.f32.xlu0 %v3321_v33  ;;  %v2301_v50 = vpop.f32.mrb[21].mxu0  ;;  %v1861_v8 = vmul.f32 %v3321_v33, %v3321_v33  ;;  %vm1707_vm10 = vcmp.lt.f32.partialorder %v1682_v60, 0.0  ;;  %v3413_v60 = vld [vmem:[#allocation6_spill] sm:$0xff] }
 0xa93   :  { %v1689_v35 = vadd.f32 1.0, %v1683_v29  ;;  %2457 = vrcp.f32 %v1683_v29  ;;  %v2090_v54 = vadd.f32 -1.0, %v1683_v29  ;;  %vm1685_vm8 = vcmp.gt.f32.partialorder %v1683_v29, 0.41421357 }
 0xa94   :  { %v3326_v14 = vpop.f32.mrb[22].mxu0  ;;  %vm1684_vm9 = vcmp.gt.f32.partialorder %v1683_v29, 2.4142137  ;;  %v1694_v46 = vsel %vm1685_vm8, 0.7853982, %v3412_v15 }
 0xa95   :  { %1864 = vadd.xlane.f32.xlu0 %v1861_v8  ;;  %v1862_v51 = vmul.f32 %v3326_v14, %v3326_v14  ;;  %v2304_v23 = vpop.f32.mrb[23].mxu0  ;;  %1854 = vadd.xlane.f32.xlu1 %v3326_v14  ;;  %2459 = vrcp.f32 %v1689_v35  ;;  %v1695_v44 = vsel %vm1684_vm9, 1.5707964, %v1694_v46  ;;  %v3414_v8 = vld [vmem:[#allocation5_spill] sm:$0xff] }
 0xa96   :  { %2461 = vpow2.f32 %v2093_v52  ;;  %v2024_v35 = vrot.slane %v3414_v8, 4 }
 0xa98   :  { %v3331_v4 = vpop.f32.mrb[24].mxu0 }
 0xa99   :  { %1866 = vadd.xlane.f32.xlu0 %v1862_v51  ;;  %v1863_v25 = vmul.f32 %v3331_v4, %v3331_v4  ;;  %1856 = vadd.xlane.f32.xlu1 %v3331_v4  ;;  %v2307_v28 = vpop.f32.mrb[25].mxu0  ;;  %v2026_v51 = vrot.slane %v3027_v34, 4 }
 0xa9d   :  { %1868 = vadd.xlane.f32.xlu0 %v1863_v25  ;;  %v2458_v10 = vpop.eup %2457 }
 0xa9e   :  { %v1687_v53 = vmul.f32 -1.0, %v2458_v10 }
 0xa9f   :  { %v2460_v24 = vpop.eup %2459 }
 0xaa0   :  { %v1691_v6 = vmul.f32 %v2460_v24, %v2090_v54  ;;  %v2462_v16 = vpop.eup %2461 }
 0xaa1   :  { %v1715_v22 = vadd.f32 1.0, %v2462_v16 }
 0xaa2   :  { %v1692_v40 = vsel %vm1685_vm8, %v1691_v6, %v1683_v29  ;;  %v2021_v29 = vrot.slane %v3413_v60, 6 }
 0xaa3   :  { %v1693_v49 = vsel %vm1684_vm9, %v1687_v53, %v1692_v40  ;;  %2463 = vrcp.f32 %v1715_v22 }
 0xaa4   :  { %v1696_v9 = vmul.f32 %v1693_v49, %v1693_v49 }
 0xaa6   :  { %v1697_v37 = vmul.f32 0.080537446, %v1696_v9  ;;  %v1703_v7 = vmul.f32 %v1696_v9, %v1693_v49 }
 0xaa8   :  { %v2091_v32 = vadd.f32 -0.13877685, %v1697_v37 }
 0xaaa   :  { %v1699_v55 = vmul.f32 %v2091_v32, %v1696_v9 }
 0xaac   :  { %v1700_v3 = vadd.f32 0.19977711, %v1699_v55 }
 0xaad   :  { %v2464_v62 = vpop.eup %2463 }
 0xaae   :  { %v1701_v5 = vmul.f32 %v1700_v3, %v1696_v9 }
 0xab0   :  { %v2092_v12 = vadd.f32 -0.3333295, %v1701_v5 }
 0xab2   :  { %v1704_v13 = vmul.f32 %v2092_v12, %v1703_v7 }
 0xab4   :  { %v1705_v57 = vadd.f32 %v1704_v13, %v1695_v44 }
 0xab6   :  { %v1706_v31 = vadd.f32 %v1705_v57, %v1693_v49  ;;  %v1846_v57 = vld [vmem:[%s3398_s11] sm:$0xff] }
 0xab8   :  { %v1708_v61 = vsub.f32 0.0, %v1706_v31 }
 0xaba   :  { %v1709_v18 = vsel %vm1707_vm10, %v1708_v61, %v1706_v31  ;;  %v1849_v61 = vld [vmem:[%s3399_s12] sm:$0xff] }
 0xabb   :  { %v1710_v56 = vmul.f32 0.31830987, %v1709_v18  ;;  %v1847_v18 = vld [vmem:[%s3398_s11 + $0x8] sm:$0xff] }
 0xabd   :  { %v1711_v63 = vadd.f32 0.5, %v1710_v56 }
 0xabf   :  { %v1722_v21 = vsub.f32 1.0, %v1711_v63  ;;  %v1719_v30 = vrot.slane %v1711_v63, 6 }
 0xac1   :  { %v1724_v20 = vrot.slane %v1722_v21, 4  ;;  %v1721_v1 = vmul.f32 %v2464_v62, %v1719_v30 }
 0xac3   :  { %v1726_v0 = vmul.f32 %v2464_v62, %v1724_v20  ;;  %v1850_v20 = vld [vmem:[%s3399_s12 + $0x8] sm:$0xff]  ;;  %v1848_v62 = vld [vmem:[%s3398_s11 + $0x10] sm:$0xff] }
 0xac5   :  { %v1728_v47 = vrot.slane %v1726_v0, 2 }
 0xac7   :  { %v1730_v59 = vadd.f32 %v1728_v47, %v1721_v1 }
 0xac9   :  { %v1732_v58 = vrot.slane %v1730_v59, 1  ;;  %v1735_v26 = vrot.slane %v1730_v59, 7 }
 0xacb   :  { %v1734_v43 = vsub.f32 %v3027_v34, %v1732_v58  ;;  %v1737_v2 = vsub.f32 %v3027_v34, %v1735_v26  ;;  %v1851_v58 = vld [vmem:[%s3399_s12 + $0x10] sm:$0xff] }
 0xacd   :  { %v1739_v48 = vrot.slane %v1734_v43, 2  ;;  %v1742_v17 = vrot.slane %v1737_v2, 2  ;;  %v1934_v43 = vld [vmem:[%s3401_s14] sm:$0xff]  ;;  %s2523_s14 = smov [#allocation2]  }
 0xace   :  { %s2041_s9 = sshll.u32 %s2523_s14, 4  ;;  %s2042_s9 = int_to_ptr.vmem [resolvable:$true] %s2041_s9 }
 0xacf   :  { %v1744_v38 = vsel %vm931_vm6, %v1739_v48, %v1742_v17  ;;  %p2500_p1 = scmp.lt.s32.totalorder %s2042_s9, %s2042_s9 }
 0xad0   :  { %v1745_v11 = vand.u32 2147483647, %v1744_v38 }
 0xad2   :  { %v1746_v41 = vsub.f32 0.0, %v1745_v11 }
 0xad4   :  { %v1747_v36 = vmul.f32 1.442695, %v1746_v41 }
 0xad6   :  { %2465 = vpow2.f32 %v1747_v36 }
 0xae0   :  { %v2466_v45 = vpop.eup %2465 }
 0xae1   :  { %v1749_v19 = vmul.f32 0.995, %v2466_v45 }
 0xae3   :  { %v1750_v27 = vadd.f32 0.005, %v1749_v19 }
 0xae5   :  { %2467 = vlog2.f32 %v1750_v27 }
 0xaef   :  { %v2468_v39 = vpop.eup %2467 }
 0xaf0   :  { %v1752_v42 = vmul.f32 0.6931472, %v2468_v39 }
 0xaf2   :  { %v1753_v50 = vsub.f32 0.0, %v1752_v42 }
 0xaf4   :  { %v2028_v23 = vsel %vm936_vm7, %v1753_v50, %v2021_v29 }
 0xaf5   :  { %v2030_v25 = vsel %vm2029_vm11, %v2028_v23, %v2024_v35 }
 0xaf6   :  { %v2032_v28 = vsel %vm2031_vm12, %v2030_v25, %v2026_v51 }
 0xaf7   :  { %2034 = vst [vmem:[#allocation2] sm:$0xff] %v2032_v28 }
 0xb1e   :  { %v1853_v10 = vpop.xlane.xlu0 %1852 }
 0xb1f   :  { %v1858_v54 = vmul.f32 0.0078125, %v1853_v10 }
 0xb21   :  { %v1873_v53 = vmul.f32 %v1858_v54, %v1858_v54 }
 0xb22   :  { %v1865_v24 = vpop.xlane.xlu0 %1864  ;;  %v1855_v6 = vpop.xlane.xlu1 %1854 }
 0xb23   :  { %v1870_v40 = vmul.f32 0.0078125, %v1865_v24  ;;  %v1859_v49 = vmul.f32 0.0078125, %v1855_v6 }
 0xb25   :  { %v1876_v52 = vsub.f32 %v1870_v40, %v1873_v53  ;;  %v1874_v9 = vmul.f32 %v1859_v49, %v1859_v49 }
 0xb26   :  { %v1867_v37 = vpop.xlane.xlu0 %1866  ;;  %v1857_v32 = vpop.xlane.xlu1 %1856 }
 0xb27   :  { %v1879_v55 = vadd.f32 1e-05, %v1876_v52  ;;  %v1871_v3 = vmul.f32 0.0078125, %v1867_v37  ;;  %v1860_v5 = vmul.f32 0.0078125, %v1857_v32 }
 0xb29   :  { %2469 = vrsqrt.f32 %v1879_v55  ;;  %v1877_v34 = vsub.f32 %v1871_v3, %v1874_v9  ;;  %v1875_v46 = vmul.f32 %v1860_v5, %v1860_v5 }
 0xb2a   :  { %v1869_v12 = vpop.xlane.xlu0 %1868 }
 0xb2b   :  { %v1880_v7 = vadd.f32 1e-05, %v1877_v34  ;;  %v1872_v16 = vmul.f32 0.0078125, %v1869_v12 }
 0xb2d   :  { %2471 = vrsqrt.f32 %v1880_v7  ;;  %v1878_v13 = vsub.f32 %v1872_v16, %v1875_v46 }
 0xb2f   :  { %v1881_v44 = vadd.f32 1e-05, %v1878_v13 }
 0xb31   :  { %2473 = vrsqrt.f32 %v1881_v44 }
 0xb33   :  { %v2470_v22 = vpop.eup %2469 }
 0xb34   :  { %v1885_v31 = vmul.f32 %v2470_v22, %v1846_v57 }
 0xb36   :  { %1896 = vperm.xlu1 %2383, %v1885_v31   ;;  %v1888_v56 = vmul.f32 %v1885_v31, %v1858_v54 }
 0xb37   :  { %v2472_v63 = vpop.eup %2471 }
 0xb38   :  { %v1891_v21 = vsub.f32 %v1849_v61, %v1888_v56  ;;  %v1886_v30 = vmul.f32 %v2472_v63, %v1847_v18 }
 0xb3a   :  { %1914 = vperm.xlu1 %2383, %v1891_v21   ;;  %1901 = vperm.xlu0 %2384, %v1886_v30   ;;  %v1889_v0 = vmul.f32 %v1886_v30, %v1859_v49 }
 0xb3b   :  { %v2474_v1 = vpop.eup %2473 }
 0xb3c   :  { %v1892_v47 = vsub.f32 %v1850_v20, %v1889_v0  ;;  %v1887_v59 = vmul.f32 %v2474_v1, %v1848_v62 }
 0xb3e   :  { %1919 = vperm.xlu1 %2383, %v1892_v47   ;;  %1906 = vperm.xlu0 %2384, %v1887_v59   ;;  %v1890_v26 = vmul.f32 %v1887_v59, %v1860_v5 }
 0xb40   :  { %v1893_v2 = vsub.f32 %v1851_v58, %v1890_v26 }
 0xb42   :  { %1937 = vperm.xlu0 %2384, %v1934_v43   ;;  %1924 = vperm.xlu1 %2383, %v1893_v2  }
 0xbb5   :  { %v1897_v48 = vpop.permute.xlu1 %1896 }
 0xbb6   :  { %v1909_v11 = vmul.f32 %v1897_v48, %v3321_v33  ;;  %v1933_v33 = vld [vmem:[%s3400_s13] sm:$0xff]  ;;  %s2495_s13 = scalar_lea.vmem %s2042_s9, 256 }
 0xbb7   :  { %p2496_p0 = scmp.ne.s32.totalorder %s2042_s9, %s2495_s13  ;;  %p2501_p2 = scmp.lt.s32.totalorder %s2495_s13, %s2495_s13 }
 0xbb9   :  { %v1915_v17 = vpop.permute.xlu1 %1914  ;;  %v1902_v38 = vpop.permute.xlu0 %1901  ;;  %p2502_p3 = por %p2501_p2, %p2500_p1 }
 0xbba   :  { %v1927_v41 = vadd.f32 %v1915_v17, %v1909_v11  ;;  %v1910_v36 = vmul.f32 %v1902_v38, %v3326_v14 }
 0xbbb   :  { %p2503_p4 = pnand %p2502_p3, %p2496_p0 }
 0xbbc   :  { %v1930_v39 = vmax.f32 %v1927_v41, 0.0 }
 0xbbd   :  { %v1920_v45 = vpop.permute.xlu1 %1919  ;;  %v1907_v19 = vpop.permute.xlu0 %1906 }
 0xbbe   :  { %v1928_v27 = vadd.f32 %v1920_v45, %v1910_v36  ;;  %v1911_v60 = vmul.f32 %v1907_v19, %v3331_v4 }
 0xbc0   :  { %v1931_v42 = vmax.f32 %v1928_v27, 0.0 }
 0xbc1   :  { %v1925_v29 = vpop.permute.xlu1 %1924  ;;  %v1938_v14 = vpop.permute.xlu0 %1937 }
 0xbc2   :  { %v2374_v50 = vpack.c.bf16 %v1931_v42, %v1930_v39  ;;  %v1929_v8 = vadd.f32 %v1925_v29, %v1911_v60 }
 0xbc4   :  { %2375 = vmatpush3.bf16.msra.mxu1 %v2374_v50  ;;  %v1932_v35 = vmax.f32 %v1929_v8, 0.0 }
 0xbc5   :  { %2312 = vmatprep.subr.mxu1 %v3412_v15 }
 0xbc8   :  { %2313 = vmatpush3.msra.mxu1 %v1932_v35 }
 0xbc9   :  { %2315 = vmatmul.mubr.msk.f32.vlgmr.msra.gmra.mrb[16].mxu1 %vm1940_vm13, %v1933_v33 }
 0xc9c   :  { %v2010_v51 = vpop.f32.mrb[16].mxu1 }
 0xc9d   :  { %v2011_v23 = vadd.f32 %v2010_v51, %v1938_v14  ;;  %v2316_v25 = vpop.f32.mrb[17].mxu1 }
 0xc9f   :  { %v2098_v28 = vmul.f32 -1.442695, %v2011_v23 }
 0xca1   :  { %2475 = vpow2.f32 %v2098_v28 }
 0xcab   :  { %v2476_v4 = vpop.eup %2475 }
 0xcac   :  { %v2017_v10 = vadd.f32 1.0, %v2476_v4 }
 0xcae   :  { %2477 = vrcp.f32 %v2017_v10 }
 0xcb8   :  { %v2478_v15 = vpop.eup %2477 }
 0xcb9   :  { %v2033_v54 = vsel %vm936_vm7, %v2478_v15, 0.0 }
 0xcba   :  { %2035 = vst [vmem:[#allocation2 + $0x8] sm:$0xff] %v2033_v54 }
 0xcbb   :  { %2506 = shalt.err (!%p2503_p4)
}
 0xcbc   :  { %s2507_s21 = scalar_lea.hbm %s3402_s15, 256 }
 0xcbd   :  { %p2508_p5 = scmp.ne.s32.totalorder %s3402_s15, %s2507_s21  ;;  %p2511_p6 = scmp.lt.u32.totalorder %s2507_s21, %s3402_s15 }
 0xcbf   :  { %p2513_p7 = pnand %p2511_p6, %p2508_p5 }
 0xcc1   :  { %2516 = shalt.err (!%p2513_p7)
}
 0xcc2   :  { %s2524_s23 = smov 128   ;;  %s2525_s24 = smov 8  }
 0xcc3   :  { %2047 = dma.vmem_to_hbm [thread:$0]  %s2042_s9, 256, %s3402_s15, [#allocation3], %s2524_s23, %s2524_s23, %s2525_s24  }
 0xcc4   :  { %2517 = dma.done.wait [#allocation3], 256  }
 0xcc5   :  { %2518 = vsyncadd [#allocation3], 4294967040 }
 0xcc6   :  { %2051 = vsyncpa [#allocation3], 1 }

</bundles_post_ra>
